<compile_context>
chip_gen: v7x
topology: tpu7x:2x2x1
jax: 0.10.0
libtpu: 0.0.40
codegen_flags: <defaults>
</compile_context>

<pallas_src>
import functools

import jax
import jax.numpy as jnp
from jax.experimental import pallas as pl
from jax.experimental.pallas import tpu as pltpu  # noqa: F401  (TPU backend)


def _encode_layer_kernel(x_ref,
                         wq_ref, bq_ref, wk_ref, bk_ref, wv_ref, bv_ref,
                         wfc_ref, bfc_ref,
                         g1_ref, be1_ref,
                         w1_ref, b1_ref, w2_ref, b2_ref,
                         g2_ref, be2_ref,
                         o_ref,
                         *, batch, seq, n_head, d_k):
    B, S = batch, seq
    M = B * S
    bf16 = jnp.bfloat16

    x = x_ref[...]                       # (B, S, D) f32
    D = x.shape[-1]
    xs = x.reshape(M, D)                 # leading-dims-only reshape (free)
    xs_bf = xs.astype(bf16)              # bf16 operands for the MXU

    scale = 1.0 / (float(d_k) ** 0.5)

    # --- Multi-head self-attention, per-head accumulation into fc output ----------
    attn_acc = jnp.zeros((M, D), jnp.float32)
    for h in range(n_head):              # static unrolled loop over heads
        # Head-major weight refs: leading-dim index, no lane slicing of live vregs.
        q = jnp.dot(xs_bf, wq_ref[h], preferred_element_type=jnp.float32) + bq_ref[h]
        k = jnp.dot(xs_bf, wk_ref[h], preferred_element_type=jnp.float32) + bk_ref[h]
        v = jnp.dot(xs_bf, wv_ref[h], preferred_element_type=jnp.float32) + bv_ref[h]

        qb = q.reshape(B, S, d_k).astype(bf16)   # leading-dims reshape (free)
        kb = k.reshape(B, S, d_k).astype(bf16)
        vb = v.reshape(B, S, d_k).astype(bf16)

        # scores: contract d_k, batch over B — no explicit transpose of k.
        score = jax.lax.dot_general(
            qb, kb,
            dimension_numbers=(((2,), (2,)), ((0,), (0,))),
            preferred_element_type=jnp.float32) * scale          # (B, S, S) f32

        score = score - jnp.max(score, axis=-1, keepdims=True)
        p = jnp.exp(score)
        attn = p * pl.reciprocal(jnp.sum(p, axis=-1, keepdims=True), approx=True)

        ctx = jax.lax.dot_general(
            attn.astype(bf16), vb,
            dimension_numbers=(((2,), (1,)), ((0,), (0,))),
            preferred_element_type=jnp.float32)                  # (B, S, d_k) f32

        # Accumulate this head's contribution to the output projection
        # (replaces concat(head_outs) @ wfc).
        attn_acc = attn_acc + jnp.dot(
            ctx.reshape(M, d_k).astype(bf16), wfc_ref[h],
            preferred_element_type=jnp.float32)                  # (M, D) f32

    attn_out = attn_acc + bfc_ref[...]

    # --- Add & Norm 1 (f32) --------------------------------------------------------
    h1 = xs + attn_out
    mu1 = jnp.mean(h1, axis=-1, keepdims=True)
    var1 = jnp.mean((h1 - mu1) ** 2, axis=-1, keepdims=True)
    h1n = (h1 - mu1) * jax.lax.rsqrt(var1 + 1e-5) * g1_ref[...] + be1_ref[...]

    # --- Feed-forward on the full (B*S, D) slab --------------------------------------
    hid = jnp.maximum(
        jnp.dot(h1n.astype(bf16), w1_ref[...],
                preferred_element_type=jnp.float32) + b1_ref[...], 0.0)
    ffn = jnp.dot(hid.astype(bf16), w2_ref[...],
                  preferred_element_type=jnp.float32) + b2_ref[...]

    # --- Add & Norm 2 (f32) --------------------------------------------------------
    h2 = h1n + ffn
    mu2 = jnp.mean(h2, axis=-1, keepdims=True)
    var2 = jnp.mean((h2 - mu2) ** 2, axis=-1, keepdims=True)
    out = (h2 - mu2) * jax.lax.rsqrt(var2 + 1e-5) * g2_ref[...] + be2_ref[...]

    # Output kept as (B*S, D); wrapper reshapes to (B, S, D).  (In-kernel lane-merge
    # reshape to (B, S*D) for lane-dense stores skipped: single tiny store here.)
    o_ref[...] = out.astype(o_ref.dtype)


def encode_layer(x, params, *, n_head, d_k):
    """x: (B, S, D) float32; params: dict of f32 weights (see init_params)."""
    B, S, D = x.shape
    H = n_head
    bf16 = jnp.bfloat16

    # Head-major, bf16 weight layout prepared outside the kernel (plain XLA ops).
    wq_h = params["wq"].reshape(D, H, d_k).transpose(1, 0, 2).astype(bf16)   # (H, D, dk)
    wk_h = params["wk"].reshape(D, H, d_k).transpose(1, 0, 2).astype(bf16)
    wv_h = params["wv"].reshape(D, H, d_k).transpose(1, 0, 2).astype(bf16)
    bq_h = params["bq"].reshape(H, 1, d_k)                                   # (H, 1, dk) f32
    bk_h = params["bk"].reshape(H, 1, d_k)
    bv_h = params["bv"].reshape(H, 1, d_k)
    wfc_h = params["wfc"].reshape(H, d_k, D).astype(bf16)                    # (H, dk, D)
    w1 = params["w1"].astype(bf16)
    w2 = params["w2"].astype(bf16)

    args = (x,
            wq_h, bq_h, wk_h, bk_h, wv_h, bv_h,
            wfc_h, params["bfc"],
            params["g1"], params["be1"],
            w1, params["b1"], w2, params["b2"],
            params["g2"], params["be2"])

    def full_spec(a):
        zeros = (0,) * a.ndim
        return pl.BlockSpec(a.shape, lambda: zeros)

    kernel = functools.partial(_encode_layer_kernel,
                               batch=B, seq=S, n_head=H, d_k=d_k)

    out = pl.pallas_call(
        kernel,
        out_shape=jax.ShapeDtypeStruct((B * S, D), x.dtype),
        in_specs=[full_spec(a) for a in args],
        out_specs=pl.BlockSpec((B * S, D), lambda: (0, 0)),
    )(*args)
    return out.reshape(B, S, D)


def init_params(key, d_model, n_head, d_k, d_ffn):
    d_hk = n_head * d_k
    ks = jax.random.split(key, 12)
    s = 0.1
    f32 = jnp.float32
    return {
        "wq":  s * jax.random.normal(ks[0], (d_model, d_hk), f32),
        "bq":  s * jax.random.normal(ks[1], (1, d_hk), f32),
        "wk":  s * jax.random.normal(ks[2], (d_model, d_hk), f32),
        "bk":  s * jax.random.normal(ks[3], (1, d_hk), f32),
        "wv":  s * jax.random.normal(ks[4], (d_model, d_hk), f32),
        "bv":  s * jax.random.normal(ks[5], (1, d_hk), f32),
        "wfc": s * jax.random.normal(ks[6], (d_hk, d_model), f32),
        "bfc": s * jax.random.normal(ks[7], (1, d_model), f32),
        "g1":  jnp.ones((1, d_model), f32),
        "be1": jnp.zeros((1, d_model), f32),
        "w1":  s * jax.random.normal(ks[8], (d_model, d_ffn), f32),
        "b1":  s * jax.random.normal(ks[9], (1, d_ffn), f32),
        "w2":  s * jax.random.normal(ks[10], (d_ffn, d_model), f32),
        "b2":  s * jax.random.normal(ks[11], (1, d_model), f32),
        "g2":  jnp.ones((1, d_model), f32),
        "be2": jnp.zeros((1, d_model), f32),
    }


def encode_layer_ref(x, p, *, n_head, d_k):
    """Pure-JAX f32 reference mirroring the PyTorch forward (eval mode)."""
    B, S, D = x.shape

    def layernorm(h, g, b):
        mu = jnp.mean(h, axis=-1, keepdims=True)
        var = jnp.mean((h - mu) ** 2, axis=-1, keepdims=True)
        return (h - mu) / jnp.sqrt(var + 1e-5) * g + b

    q = (x @ p["wq"] + p["bq"]).reshape(B, S, n_head, d_k).transpose(0, 2, 1, 3)
    k = (x @ p["wk"] + p["bk"]).reshape(B, S, n_head, d_k).transpose(0, 2, 1, 3)
    v = (x @ p["wv"] + p["bv"]).reshape(B, S, n_head, d_k).transpose(0, 2, 1, 3)
    score = jnp.einsum("bhqd,bhkd->bhqk", q, k) / (d_k ** 0.5)
    attn = jax.nn.softmax(score, axis=-1)
    o = jnp.einsum("bhqk,bhkd->bhqd", attn, v).transpose(0, 2, 1, 3).reshape(B, S, -1)
    attn_out = o @ p["wfc"] + p["bfc"]
    h1 = layernorm(x + attn_out, p["g1"], p["be1"])
    ffn = jnp.maximum(h1 @ p["w1"] + p["b1"], 0.0) @ p["w2"] + p["b2"]
    return layernorm(h1 + ffn, p["g2"], p["be2"])


if __name__ == "__main__":
    B, S = 2, 8
    d_model, n_head, d_k, d_ffn = 32, 4, 8, 64

    key = jax.random.PRNGKey(0)
    kx, kp = jax.random.split(key)
    x = jax.random.normal(kx, (B, S, d_model), jnp.float32)
    params = init_params(kp, d_model, n_head, d_k, d_ffn)

    out = encode_layer(x, params, n_head=n_head, d_k=d_k)
    out = jax.block_until_ready(out)

    ref = encode_layer_ref(x, params, n_head=n_head, d_k=d_k)
    assert out.shape == (B, S, d_model)
    # Tolerance loosened vs. the pure-f32 reference because matmul operands are bf16
    # (MXU-native) and the softmax reciprocal uses the approximate EUP path.
    err = float(jnp.max(jnp.abs(out - ref)))
    assert err < 1e-1, f"mismatch vs reference: max abs err = {err}"

    print("KERNEL_OK")
</pallas_src>

<mosaic_0001>
module attributes {stable_mosaic.version = 11 : i64} {
  func.func @_encode_layer_kernel(%arg0: memref<2x8x32xf32, #tpu.memory_space<vmem>>, %arg1: memref<4x32x8xbf16, #tpu.memory_space<vmem>>, %arg2: memref<4x1x8xf32, #tpu.memory_space<vmem>>, %arg3: memref<4x32x8xbf16, #tpu.memory_space<vmem>>, %arg4: memref<4x1x8xf32, #tpu.memory_space<vmem>>, %arg5: memref<4x32x8xbf16, #tpu.memory_space<vmem>>, %arg6: memref<4x1x8xf32, #tpu.memory_space<vmem>>, %arg7: memref<4x8x32xbf16, #tpu.memory_space<vmem>>, %arg8: memref<1x32xf32, #tpu.memory_space<vmem>>, %arg9: memref<1x32xf32, #tpu.memory_space<vmem>>, %arg10: memref<1x32xf32, #tpu.memory_space<vmem>>, %arg11: memref<32x64xbf16, #tpu.memory_space<vmem>>, %arg12: memref<1x64xf32, #tpu.memory_space<vmem>>, %arg13: memref<64x32xbf16, #tpu.memory_space<vmem>>, %arg14: memref<1x32xf32, #tpu.memory_space<vmem>>, %arg15: memref<1x32xf32, #tpu.memory_space<vmem>>, %arg16: memref<1x32xf32, #tpu.memory_space<vmem>>, %arg17: memref<16x32xf32, #tpu.memory_space<vmem>>) attributes {dimension_semantics = [], scalar_prefetch = 0 : i64, scratch_operands = 0 : i64, tpu.core_type = #tpu.core_type<tc>} {
    %c0 = arith.constant 0 : index
    %c0_0 = arith.constant 0 : index
    %c0_1 = arith.constant 0 : index
    %0 = vector.load %arg0[%c0, %c0_0, %c0_1] : memref<2x8x32xf32, #tpu.memory_space<vmem>>, vector<2x8x32xf32>
    %1 = vector.shape_cast %0 : vector<2x8x32xf32> to vector<16x32xf32>
    %2 = arith.truncf %1 : vector<16x32xf32> to vector<16x32xbf16>
    %cst = arith.constant 0.000000e+00 : f32
    %3 = vector.broadcast %cst : f32 to vector<16x32xf32>
    %c0_2 = arith.constant 0 : index
    %c0_3 = arith.constant 0 : index
    %c0_4 = arith.constant 0 : index
    %4 = vector.load %arg1[%c0_2, %c0_3, %c0_4] : memref<4x32x8xbf16, #tpu.memory_space<vmem>>, vector<1x32x8xbf16>
    %5 = vector.shape_cast %4 : vector<1x32x8xbf16> to vector<32x8xbf16>
    %cst_5 = arith.constant dense<0.000000e+00> : vector<16x8xf32>
    %6 = tpu.matmul %2, %5, %cst_5 {dimension_numbers = #tpu.dot_dimension_numbers<[1], [0], [0], [1], [0, 0, 1, 1], [], []>} : vector<16x32xbf16>, vector<32x8xbf16>, vector<16x8xf32> -> vector<16x8xf32>
    %c0_6 = arith.constant 0 : index
    %c0_7 = arith.constant 0 : index
    %c0_8 = arith.constant 0 : index
    %7 = vector.load %arg2[%c0_6, %c0_7, %c0_8] : memref<4x1x8xf32, #tpu.memory_space<vmem>>, vector<1x1x8xf32>
    %8 = vector.shape_cast %7 : vector<1x1x8xf32> to vector<1x8xf32>
    %9 = vector.broadcast %8 : vector<1x8xf32> to vector<16x8xf32>
    %10 = arith.addf %6, %9 : vector<16x8xf32>
    %c0_9 = arith.constant 0 : index
    %c0_10 = arith.constant 0 : index
    %c0_11 = arith.constant 0 : index
    %11 = vector.load %arg3[%c0_9, %c0_10, %c0_11] : memref<4x32x8xbf16, #tpu.memory_space<vmem>>, vector<1x32x8xbf16>
    %12 = vector.shape_cast %11 : vector<1x32x8xbf16> to vector<32x8xbf16>
    %cst_12 = arith.constant dense<0.000000e+00> : vector<16x8xf32>
    %13 = tpu.matmul %2, %12, %cst_12 {dimension_numbers = #tpu.dot_dimension_numbers<[1], [0], [0], [1], [0, 0, 1, 1], [], []>} : vector<16x32xbf16>, vector<32x8xbf16>, vector<16x8xf32> -> vector<16x8xf32>
    %c0_13 = arith.constant 0 : index
    %c0_14 = arith.constant 0 : index
    %c0_15 = arith.constant 0 : index
    %14 = vector.load %arg4[%c0_13, %c0_14, %c0_15] : memref<4x1x8xf32, #tpu.memory_space<vmem>>, vector<1x1x8xf32>
    %15 = vector.shape_cast %14 : vector<1x1x8xf32> to vector<1x8xf32>
    %16 = vector.broadcast %15 : vector<1x8xf32> to vector<16x8xf32>
    %17 = arith.addf %13, %16 : vector<16x8xf32>
    %c0_16 = arith.constant 0 : index
    %c0_17 = arith.constant 0 : index
    %c0_18 = arith.constant 0 : index
    %18 = vector.load %arg5[%c0_16, %c0_17, %c0_18] : memref<4x32x8xbf16, #tpu.memory_space<vmem>>, vector<1x32x8xbf16>
    %19 = vector.shape_cast %18 : vector<1x32x8xbf16> to vector<32x8xbf16>
    %cst_19 = arith.constant dense<0.000000e+00> : vector<16x8xf32>
    %20 = tpu.matmul %2, %19, %cst_19 {dimension_numbers = #tpu.dot_dimension_numbers<[1], [0], [0], [1], [0, 0, 1, 1], [], []>} : vector<16x32xbf16>, vector<32x8xbf16>, vector<16x8xf32> -> vector<16x8xf32>
    %c0_20 = arith.constant 0 : index
    %c0_21 = arith.constant 0 : index
    %c0_22 = arith.constant 0 : index
    %21 = vector.load %arg6[%c0_20, %c0_21, %c0_22] : memref<4x1x8xf32, #tpu.memory_space<vmem>>, vector<1x1x8xf32>
    %22 = vector.shape_cast %21 : vector<1x1x8xf32> to vector<1x8xf32>
    %23 = vector.broadcast %22 : vector<1x8xf32> to vector<16x8xf32>
    %24 = arith.addf %20, %23 : vector<16x8xf32>
    %25 = vector.shape_cast %10 : vector<16x8xf32> to vector<2x8x8xf32>
    %26 = arith.truncf %25 : vector<2x8x8xf32> to vector<2x8x8xbf16>
    %27 = vector.shape_cast %17 : vector<16x8xf32> to vector<2x8x8xf32>
    %28 = arith.truncf %27 : vector<2x8x8xf32> to vector<2x8x8xbf16>
    %29 = vector.shape_cast %24 : vector<16x8xf32> to vector<2x8x8xf32>
    %30 = arith.truncf %29 : vector<2x8x8xf32> to vector<2x8x8xbf16>
    %cst_23 = arith.constant dense<0.000000e+00> : vector<2x8x8xf32>
    %31 = tpu.matmul %26, %28, %cst_23 {dimension_numbers = #tpu.dot_dimension_numbers<[2], [2], [1], [1], [0, 0, 0, 1, 1, 1], [0], [0]>} : vector<2x8x8xbf16>, vector<2x8x8xbf16>, vector<2x8x8xf32> -> vector<2x8x8xf32>
    %cst_24 = arith.constant 0.353553385 : f32
    %32 = vector.broadcast %cst_24 : f32 to vector<2x8x8xf32>
    %33 = arith.mulf %31, %32 : vector<2x8x8xf32>
    %cst_25 = arith.constant dense<0xFF800000> : vector<2x8xf32>
    %34 = vector.multi_reduction <maximumf>, %33, %cst_25 [2] : vector<2x8x8xf32> to vector<2x8xf32>
    %35 = vector.shape_cast %34 : vector<2x8xf32> to vector<2x8x1xf32>
    %36 = vector.broadcast %35 : vector<2x8x1xf32> to vector<2x8x8xf32>
    %37 = arith.subf %33, %36 : vector<2x8x8xf32>
    %38 = math.exp %37 : vector<2x8x8xf32>
    %cst_26 = arith.constant dense<0.000000e+00> : vector<2x8xf32>
    %39 = vector.multi_reduction <add>, %38, %cst_26 [2] : vector<2x8x8xf32> to vector<2x8xf32>
    %40 = vector.shape_cast %39 : vector<2x8xf32> to vector<2x8x1xf32>
    %41 = tpu.reciprocal %40 {approx = true} : vector<2x8x1xf32> -> vector<2x8x1xf32>
    %42 = vector.broadcast %41 : vector<2x8x1xf32> to vector<2x8x8xf32>
    %43 = arith.mulf %38, %42 : vector<2x8x8xf32>
    %44 = arith.truncf %43 : vector<2x8x8xf32> to vector<2x8x8xbf16>
    %cst_27 = arith.constant dense<0.000000e+00> : vector<2x8x8xf32>
    %45 = tpu.matmul %44, %30, %cst_27 {dimension_numbers = #tpu.dot_dimension_numbers<[2], [1], [1], [2], [0, 0, 0, 1, 1, 2], [0], [0]>} : vector<2x8x8xbf16>, vector<2x8x8xbf16>, vector<2x8x8xf32> -> vector<2x8x8xf32>
    %46 = vector.shape_cast %45 : vector<2x8x8xf32> to vector<16x8xf32>
    %47 = arith.truncf %46 : vector<16x8xf32> to vector<16x8xbf16>
    %c0_28 = arith.constant 0 : index
    %c0_29 = arith.constant 0 : index
    %c0_30 = arith.constant 0 : index
    %48 = vector.load %arg7[%c0_28, %c0_29, %c0_30] : memref<4x8x32xbf16, #tpu.memory_space<vmem>>, vector<1x8x32xbf16>
    %49 = vector.shape_cast %48 : vector<1x8x32xbf16> to vector<8x32xbf16>
    %cst_31 = arith.constant dense<0.000000e+00> : vector<16x32xf32>
    %50 = tpu.matmul %47, %49, %cst_31 {dimension_numbers = #tpu.dot_dimension_numbers<[1], [0], [0], [1], [0, 0, 1, 1], [], []>} : vector<16x8xbf16>, vector<8x32xbf16>, vector<16x32xf32> -> vector<16x32xf32>
    %51 = arith.addf %3, %50 : vector<16x32xf32>
    %c1 = arith.constant 1 : index
    %c0_32 = arith.constant 0 : index
    %c0_33 = arith.constant 0 : index
    %52 = vector.load %arg1[%c1, %c0_32, %c0_33] : memref<4x32x8xbf16, #tpu.memory_space<vmem>>, vector<1x32x8xbf16>
    %53 = vector.shape_cast %52 : vector<1x32x8xbf16> to vector<32x8xbf16>
    %cst_34 = arith.constant dense<0.000000e+00> : vector<16x8xf32>
    %54 = tpu.matmul %2, %53, %cst_34 {dimension_numbers = #tpu.dot_dimension_numbers<[1], [0], [0], [1], [0, 0, 1, 1], [], []>} : vector<16x32xbf16>, vector<32x8xbf16>, vector<16x8xf32> -> vector<16x8xf32>
    %c1_35 = arith.constant 1 : index
    %c0_36 = arith.constant 0 : index
    %c0_37 = arith.constant 0 : index
    %55 = vector.load %arg2[%c1_35, %c0_36, %c0_37] : memref<4x1x8xf32, #tpu.memory_space<vmem>>, vector<1x1x8xf32>
    %56 = vector.shape_cast %55 : vector<1x1x8xf32> to vector<1x8xf32>
    %57 = vector.broadcast %56 : vector<1x8xf32> to vector<16x8xf32>
    %58 = arith.addf %54, %57 : vector<16x8xf32>
    %c1_38 = arith.constant 1 : index
    %c0_39 = arith.constant 0 : index
    %c0_40 = arith.constant 0 : index
    %59 = vector.load %arg3[%c1_38, %c0_39, %c0_40] : memref<4x32x8xbf16, #tpu.memory_space<vmem>>, vector<1x32x8xbf16>
    %60 = vector.shape_cast %59 : vector<1x32x8xbf16> to vector<32x8xbf16>
    %cst_41 = arith.constant dense<0.000000e+00> : vector<16x8xf32>
    %61 = tpu.matmul %2, %60, %cst_41 {dimension_numbers = #tpu.dot_dimension_numbers<[1], [0], [0], [1], [0, 0, 1, 1], [], []>} : vector<16x32xbf16>, vector<32x8xbf16>, vector<16x8xf32> -> vector<16x8xf32>
    %c1_42 = arith.constant 1 : index
    %c0_43 = arith.constant 0 : index
    %c0_44 = arith.constant 0 : index
    %62 = vector.load %arg4[%c1_42, %c0_43, %c0_44] : memref<4x1x8xf32, #tpu.memory_space<vmem>>, vector<1x1x8xf32>
    %63 = vector.shape_cast %62 : vector<1x1x8xf32> to vector<1x8xf32>
    %64 = vector.broadcast %63 : vector<1x8xf32> to vector<16x8xf32>
    %65 = arith.addf %61, %64 : vector<16x8xf32>
    %c1_45 = arith.constant 1 : index
    %c0_46 = arith.constant 0 : index
    %c0_47 = arith.constant 0 : index
    %66 = vector.load %arg5[%c1_45, %c0_46, %c0_47] : memref<4x32x8xbf16, #tpu.memory_space<vmem>>, vector<1x32x8xbf16>
    %67 = vector.shape_cast %66 : vector<1x32x8xbf16> to vector<32x8xbf16>
    %cst_48 = arith.constant dense<0.000000e+00> : vector<16x8xf32>
    %68 = tpu.matmul %2, %67, %cst_48 {dimension_numbers = #tpu.dot_dimension_numbers<[1], [0], [0], [1], [0, 0, 1, 1], [], []>} : vector<16x32xbf16>, vector<32x8xbf16>, vector<16x8xf32> -> vector<16x8xf32>
    %c1_49 = arith.constant 1 : index
    %c0_50 = arith.constant 0 : index
    %c0_51 = arith.constant 0 : index
    %69 = vector.load %arg6[%c1_49, %c0_50, %c0_51] : memref<4x1x8xf32, #tpu.memory_space<vmem>>, vector<1x1x8xf32>
    %70 = vector.shape_cast %69 : vector<1x1x8xf32> to vector<1x8xf32>
    %71 = vector.broadcast %70 : vector<1x8xf32> to vector<16x8xf32>
    %72 = arith.addf %68, %71 : vector<16x8xf32>
    %73 = vector.shape_cast %58 : vector<16x8xf32> to vector<2x8x8xf32>
    %74 = arith.truncf %73 : vector<2x8x8xf32> to vector<2x8x8xbf16>
    %75 = vector.shape_cast %65 : vector<16x8xf32> to vector<2x8x8xf32>
    %76 = arith.truncf %75 : vector<2x8x8xf32> to vector<2x8x8xbf16>
    %77 = vector.shape_cast %72 : vector<16x8xf32> to vector<2x8x8xf32>
    %78 = arith.truncf %77 : vector<2x8x8xf32> to vector<2x8x8xbf16>
    %cst_52 = arith.constant dense<0.000000e+00> : vector<2x8x8xf32>
    %79 = tpu.matmul %74, %76, %cst_52 {dimension_numbers = #tpu.dot_dimension_numbers<[2], [2], [1], [1], [0, 0, 0, 1, 1, 1], [0], [0]>} : vector<2x8x8xbf16>, vector<2x8x8xbf16>, vector<2x8x8xf32> -> vector<2x8x8xf32>
    %cst_53 = arith.constant 0.353553385 : f32
    %80 = vector.broadcast %cst_53 : f32 to vector<2x8x8xf32>
    %81 = arith.mulf %79, %80 : vector<2x8x8xf32>
    %cst_54 = arith.constant dense<0xFF800000> : vector<2x8xf32>
    %82 = vector.multi_reduction <maximumf>, %81, %cst_54 [2] : vector<2x8x8xf32> to vector<2x8xf32>
    %83 = vector.shape_cast %82 : vector<2x8xf32> to vector<2x8x1xf32>
    %84 = vector.broadcast %83 : vector<2x8x1xf32> to vector<2x8x8xf32>
    %85 = arith.subf %81, %84 : vector<2x8x8xf32>
    %86 = math.exp %85 : vector<2x8x8xf32>
    %cst_55 = arith.constant dense<0.000000e+00> : vector<2x8xf32>
    %87 = vector.multi_reduction <add>, %86, %cst_55 [2] : vector<2x8x8xf32> to vector<2x8xf32>
    %88 = vector.shape_cast %87 : vector<2x8xf32> to vector<2x8x1xf32>
    %89 = tpu.reciprocal %88 {approx = true} : vector<2x8x1xf32> -> vector<2x8x1xf32>
    %90 = vector.broadcast %89 : vector<2x8x1xf32> to vector<2x8x8xf32>
    %91 = arith.mulf %86, %90 : vector<2x8x8xf32>
    %92 = arith.truncf %91 : vector<2x8x8xf32> to vector<2x8x8xbf16>
    %cst_56 = arith.constant dense<0.000000e+00> : vector<2x8x8xf32>
    %93 = tpu.matmul %92, %78, %cst_56 {dimension_numbers = #tpu.dot_dimension_numbers<[2], [1], [1], [2], [0, 0, 0, 1, 1, 2], [0], [0]>} : vector<2x8x8xbf16>, vector<2x8x8xbf16>, vector<2x8x8xf32> -> vector<2x8x8xf32>
    %94 = vector.shape_cast %93 : vector<2x8x8xf32> to vector<16x8xf32>
    %95 = arith.truncf %94 : vector<16x8xf32> to vector<16x8xbf16>
    %c1_57 = arith.constant 1 : index
    %c0_58 = arith.constant 0 : index
    %c0_59 = arith.constant 0 : index
    %96 = vector.load %arg7[%c1_57, %c0_58, %c0_59] : memref<4x8x32xbf16, #tpu.memory_space<vmem>>, vector<1x8x32xbf16>
    %97 = vector.shape_cast %96 : vector<1x8x32xbf16> to vector<8x32xbf16>
    %cst_60 = arith.constant dense<0.000000e+00> : vector<16x32xf32>
    %98 = tpu.matmul %95, %97, %cst_60 {dimension_numbers = #tpu.dot_dimension_numbers<[1], [0], [0], [1], [0, 0, 1, 1], [], []>} : vector<16x8xbf16>, vector<8x32xbf16>, vector<16x32xf32> -> vector<16x32xf32>
    %99 = arith.addf %51, %98 : vector<16x32xf32>
    %c2 = arith.constant 2 : index
    %c0_61 = arith.constant 0 : index
    %c0_62 = arith.constant 0 : index
    %100 = vector.load %arg1[%c2, %c0_61, %c0_62] : memref<4x32x8xbf16, #tpu.memory_space<vmem>>, vector<1x32x8xbf16>
    %101 = vector.shape_cast %100 : vector<1x32x8xbf16> to vector<32x8xbf16>
    %cst_63 = arith.constant dense<0.000000e+00> : vector<16x8xf32>
    %102 = tpu.matmul %2, %101, %cst_63 {dimension_numbers = #tpu.dot_dimension_numbers<[1], [0], [0], [1], [0, 0, 1, 1], [], []>} : vector<16x32xbf16>, vector<32x8xbf16>, vector<16x8xf32> -> vector<16x8xf32>
    %c2_64 = arith.constant 2 : index
    %c0_65 = arith.constant 0 : index
    %c0_66 = arith.constant 0 : index
    %103 = vector.load %arg2[%c2_64, %c0_65, %c0_66] : memref<4x1x8xf32, #tpu.memory_space<vmem>>, vector<1x1x8xf32>
    %104 = vector.shape_cast %103 : vector<1x1x8xf32> to vector<1x8xf32>
    %105 = vector.broadcast %104 : vector<1x8xf32> to vector<16x8xf32>
    %106 = arith.addf %102, %105 : vector<16x8xf32>
    %c2_67 = arith.constant 2 : index
    %c0_68 = arith.constant 0 : index
    %c0_69 = arith.constant 0 : index
    %107 = vector.load %arg3[%c2_67, %c0_68, %c0_69] : memref<4x32x8xbf16, #tpu.memory_space<vmem>>, vector<1x32x8xbf16>
    %108 = vector.shape_cast %107 : vector<1x32x8xbf16> to vector<32x8xbf16>
    %cst_70 = arith.constant dense<0.000000e+00> : vector<16x8xf32>
    %109 = tpu.matmul %2, %108, %cst_70 {dimension_numbers = #tpu.dot_dimension_numbers<[1], [0], [0], [1], [0, 0, 1, 1], [], []>} : vector<16x32xbf16>, vector<32x8xbf16>, vector<16x8xf32> -> vector<16x8xf32>
    %c2_71 = arith.constant 2 : index
    %c0_72 = arith.constant 0 : index
    %c0_73 = arith.constant 0 : index
    %110 = vector.load %arg4[%c2_71, %c0_72, %c0_73] : memref<4x1x8xf32, #tpu.memory_space<vmem>>, vector<1x1x8xf32>
    %111 = vector.shape_cast %110 : vector<1x1x8xf32> to vector<1x8xf32>
    %112 = vector.broadcast %111 : vector<1x8xf32> to vector<16x8xf32>
    %113 = arith.addf %109, %112 : vector<16x8xf32>
    %c2_74 = arith.constant 2 : index
    %c0_75 = arith.constant 0 : index
    %c0_76 = arith.constant 0 : index
    %114 = vector.load %arg5[%c2_74, %c0_75, %c0_76] : memref<4x32x8xbf16, #tpu.memory_space<vmem>>, vector<1x32x8xbf16>
    %115 = vector.shape_cast %114 : vector<1x32x8xbf16> to vector<32x8xbf16>
    %cst_77 = arith.constant dense<0.000000e+00> : vector<16x8xf32>
    %116 = tpu.matmul %2, %115, %cst_77 {dimension_numbers = #tpu.dot_dimension_numbers<[1], [0], [0], [1], [0, 0, 1, 1], [], []>} : vector<16x32xbf16>, vector<32x8xbf16>, vector<16x8xf32> -> vector<16x8xf32>
    %c2_78 = arith.constant 2 : index
    %c0_79 = arith.constant 0 : index
    %c0_80 = arith.constant 0 : index
    %117 = vector.load %arg6[%c2_78, %c0_79, %c0_80] : memref<4x1x8xf32, #tpu.memory_space<vmem>>, vector<1x1x8xf32>
    %118 = vector.shape_cast %117 : vector<1x1x8xf32> to vector<1x8xf32>
    %119 = vector.broadcast %118 : vector<1x8xf32> to vector<16x8xf32>
    %120 = arith.addf %116, %119 : vector<16x8xf32>
    %121 = vector.shape_cast %106 : vector<16x8xf32> to vector<2x8x8xf32>
    %122 = arith.truncf %121 : vector<2x8x8xf32> to vector<2x8x8xbf16>
    %123 = vector.shape_cast %113 : vector<16x8xf32> to vector<2x8x8xf32>
    %124 = arith.truncf %123 : vector<2x8x8xf32> to vector<2x8x8xbf16>
    %125 = vector.shape_cast %120 : vector<16x8xf32> to vector<2x8x8xf32>
    %126 = arith.truncf %125 : vector<2x8x8xf32> to vector<2x8x8xbf16>
    %cst_81 = arith.constant dense<0.000000e+00> : vector<2x8x8xf32>
    %127 = tpu.matmul %122, %124, %cst_81 {dimension_numbers = #tpu.dot_dimension_numbers<[2], [2], [1], [1], [0, 0, 0, 1, 1, 1], [0], [0]>} : vector<2x8x8xbf16>, vector<2x8x8xbf16>, vector<2x8x8xf32> -> vector<2x8x8xf32>
    %cst_82 = arith.constant 0.353553385 : f32
    %128 = vector.broadcast %cst_82 : f32 to vector<2x8x8xf32>
    %129 = arith.mulf %127, %128 : vector<2x8x8xf32>
    %cst_83 = arith.constant dense<0xFF800000> : vector<2x8xf32>
    %130 = vector.multi_reduction <maximumf>, %129, %cst_83 [2] : vector<2x8x8xf32> to vector<2x8xf32>
    %131 = vector.shape_cast %130 : vector<2x8xf32> to vector<2x8x1xf32>
    %132 = vector.broadcast %131 : vector<2x8x1xf32> to vector<2x8x8xf32>
    %133 = arith.subf %129, %132 : vector<2x8x8xf32>
    %134 = math.exp %133 : vector<2x8x8xf32>
    %cst_84 = arith.constant dense<0.000000e+00> : vector<2x8xf32>
    %135 = vector.multi_reduction <add>, %134, %cst_84 [2] : vector<2x8x8xf32> to vector<2x8xf32>
    %136 = vector.shape_cast %135 : vector<2x8xf32> to vector<2x8x1xf32>
    %137 = tpu.reciprocal %136 {approx = true} : vector<2x8x1xf32> -> vector<2x8x1xf32>
    %138 = vector.broadcast %137 : vector<2x8x1xf32> to vector<2x8x8xf32>
    %139 = arith.mulf %134, %138 : vector<2x8x8xf32>
    %140 = arith.truncf %139 : vector<2x8x8xf32> to vector<2x8x8xbf16>
    %cst_85 = arith.constant dense<0.000000e+00> : vector<2x8x8xf32>
    %141 = tpu.matmul %140, %126, %cst_85 {dimension_numbers = #tpu.dot_dimension_numbers<[2], [1], [1], [2], [0, 0, 0, 1, 1, 2], [0], [0]>} : vector<2x8x8xbf16>, vector<2x8x8xbf16>, vector<2x8x8xf32> -> vector<2x8x8xf32>
    %142 = vector.shape_cast %141 : vector<2x8x8xf32> to vector<16x8xf32>
    %143 = arith.truncf %142 : vector<16x8xf32> to vector<16x8xbf16>
    %c2_86 = arith.constant 2 : index
    %c0_87 = arith.constant 0 : index
    %c0_88 = arith.constant 0 : index
    %144 = vector.load %arg7[%c2_86, %c0_87, %c0_88] : memref<4x8x32xbf16, #tpu.memory_space<vmem>>, vector<1x8x32xbf16>
    %145 = vector.shape_cast %144 : vector<1x8x32xbf16> to vector<8x32xbf16>
    %cst_89 = arith.constant dense<0.000000e+00> : vector<16x32xf32>
    %146 = tpu.matmul %143, %145, %cst_89 {dimension_numbers = #tpu.dot_dimension_numbers<[1], [0], [0], [1], [0, 0, 1, 1], [], []>} : vector<16x8xbf16>, vector<8x32xbf16>, vector<16x32xf32> -> vector<16x32xf32>
    %147 = arith.addf %99, %146 : vector<16x32xf32>
    %c3 = arith.constant 3 : index
    %c0_90 = arith.constant 0 : index
    %c0_91 = arith.constant 0 : index
    %148 = vector.load %arg1[%c3, %c0_90, %c0_91] : memref<4x32x8xbf16, #tpu.memory_space<vmem>>, vector<1x32x8xbf16>
    %149 = vector.shape_cast %148 : vector<1x32x8xbf16> to vector<32x8xbf16>
    %cst_92 = arith.constant dense<0.000000e+00> : vector<16x8xf32>
    %150 = tpu.matmul %2, %149, %cst_92 {dimension_numbers = #tpu.dot_dimension_numbers<[1], [0], [0], [1], [0, 0, 1, 1], [], []>} : vector<16x32xbf16>, vector<32x8xbf16>, vector<16x8xf32> -> vector<16x8xf32>
    %c3_93 = arith.constant 3 : index
    %c0_94 = arith.constant 0 : index
    %c0_95 = arith.constant 0 : index
    %151 = vector.load %arg2[%c3_93, %c0_94, %c0_95] : memref<4x1x8xf32, #tpu.memory_space<vmem>>, vector<1x1x8xf32>
    %152 = vector.shape_cast %151 : vector<1x1x8xf32> to vector<1x8xf32>
    %153 = vector.broadcast %152 : vector<1x8xf32> to vector<16x8xf32>
    %154 = arith.addf %150, %153 : vector<16x8xf32>
    %c3_96 = arith.constant 3 : index
    %c0_97 = arith.constant 0 : index
    %c0_98 = arith.constant 0 : index
    %155 = vector.load %arg3[%c3_96, %c0_97, %c0_98] : memref<4x32x8xbf16, #tpu.memory_space<vmem>>, vector<1x32x8xbf16>
    %156 = vector.shape_cast %155 : vector<1x32x8xbf16> to vector<32x8xbf16>
    %cst_99 = arith.constant dense<0.000000e+00> : vector<16x8xf32>
    %157 = tpu.matmul %2, %156, %cst_99 {dimension_numbers = #tpu.dot_dimension_numbers<[1], [0], [0], [1], [0, 0, 1, 1], [], []>} : vector<16x32xbf16>, vector<32x8xbf16>, vector<16x8xf32> -> vector<16x8xf32>
    %c3_100 = arith.constant 3 : index
    %c0_101 = arith.constant 0 : index
    %c0_102 = arith.constant 0 : index
    %158 = vector.load %arg4[%c3_100, %c0_101, %c0_102] : memref<4x1x8xf32, #tpu.memory_space<vmem>>, vector<1x1x8xf32>
    %159 = vector.shape_cast %158 : vector<1x1x8xf32> to vector<1x8xf32>
    %160 = vector.broadcast %159 : vector<1x8xf32> to vector<16x8xf32>
    %161 = arith.addf %157, %160 : vector<16x8xf32>
    %c3_103 = arith.constant 3 : index
    %c0_104 = arith.constant 0 : index
    %c0_105 = arith.constant 0 : index
    %162 = vector.load %arg5[%c3_103, %c0_104, %c0_105] : memref<4x32x8xbf16, #tpu.memory_space<vmem>>, vector<1x32x8xbf16>
    %163 = vector.shape_cast %162 : vector<1x32x8xbf16> to vector<32x8xbf16>
    %cst_106 = arith.constant dense<0.000000e+00> : vector<16x8xf32>
    %164 = tpu.matmul %2, %163, %cst_106 {dimension_numbers = #tpu.dot_dimension_numbers<[1], [0], [0], [1], [0, 0, 1, 1], [], []>} : vector<16x32xbf16>, vector<32x8xbf16>, vector<16x8xf32> -> vector<16x8xf32>
    %c3_107 = arith.constant 3 : index
    %c0_108 = arith.constant 0 : index
    %c0_109 = arith.constant 0 : index
    %165 = vector.load %arg6[%c3_107, %c0_108, %c0_109] : memref<4x1x8xf32, #tpu.memory_space<vmem>>, vector<1x1x8xf32>
    %166 = vector.shape_cast %165 : vector<1x1x8xf32> to vector<1x8xf32>
    %167 = vector.broadcast %166 : vector<1x8xf32> to vector<16x8xf32>
    %168 = arith.addf %164, %167 : vector<16x8xf32>
    %169 = vector.shape_cast %154 : vector<16x8xf32> to vector<2x8x8xf32>
    %170 = arith.truncf %169 : vector<2x8x8xf32> to vector<2x8x8xbf16>
    %171 = vector.shape_cast %161 : vector<16x8xf32> to vector<2x8x8xf32>
    %172 = arith.truncf %171 : vector<2x8x8xf32> to vector<2x8x8xbf16>
    %173 = vector.shape_cast %168 : vector<16x8xf32> to vector<2x8x8xf32>
    %174 = arith.truncf %173 : vector<2x8x8xf32> to vector<2x8x8xbf16>
    %cst_110 = arith.constant dense<0.000000e+00> : vector<2x8x8xf32>
    %175 = tpu.matmul %170, %172, %cst_110 {dimension_numbers = #tpu.dot_dimension_numbers<[2], [2], [1], [1], [0, 0, 0, 1, 1, 1], [0], [0]>} : vector<2x8x8xbf16>, vector<2x8x8xbf16>, vector<2x8x8xf32> -> vector<2x8x8xf32>
    %cst_111 = arith.constant 0.353553385 : f32
    %176 = vector.broadcast %cst_111 : f32 to vector<2x8x8xf32>
    %177 = arith.mulf %175, %176 : vector<2x8x8xf32>
    %cst_112 = arith.constant dense<0xFF800000> : vector<2x8xf32>
    %178 = vector.multi_reduction <maximumf>, %177, %cst_112 [2] : vector<2x8x8xf32> to vector<2x8xf32>
    %179 = vector.shape_cast %178 : vector<2x8xf32> to vector<2x8x1xf32>
    %180 = vector.broadcast %179 : vector<2x8x1xf32> to vector<2x8x8xf32>
    %181 = arith.subf %177, %180 : vector<2x8x8xf32>
    %182 = math.exp %181 : vector<2x8x8xf32>
    %cst_113 = arith.constant dense<0.000000e+00> : vector<2x8xf32>
    %183 = vector.multi_reduction <add>, %182, %cst_113 [2] : vector<2x8x8xf32> to vector<2x8xf32>
    %184 = vector.shape_cast %183 : vector<2x8xf32> to vector<2x8x1xf32>
    %185 = tpu.reciprocal %184 {approx = true} : vector<2x8x1xf32> -> vector<2x8x1xf32>
    %186 = vector.broadcast %185 : vector<2x8x1xf32> to vector<2x8x8xf32>
    %187 = arith.mulf %182, %186 : vector<2x8x8xf32>
    %188 = arith.truncf %187 : vector<2x8x8xf32> to vector<2x8x8xbf16>
    %cst_114 = arith.constant dense<0.000000e+00> : vector<2x8x8xf32>
    %189 = tpu.matmul %188, %174, %cst_114 {dimension_numbers = #tpu.dot_dimension_numbers<[2], [1], [1], [2], [0, 0, 0, 1, 1, 2], [0], [0]>} : vector<2x8x8xbf16>, vector<2x8x8xbf16>, vector<2x8x8xf32> -> vector<2x8x8xf32>
    %190 = vector.shape_cast %189 : vector<2x8x8xf32> to vector<16x8xf32>
    %191 = arith.truncf %190 : vector<16x8xf32> to vector<16x8xbf16>
    %c3_115 = arith.constant 3 : index
    %c0_116 = arith.constant 0 : index
    %c0_117 = arith.constant 0 : index
    %192 = vector.load %arg7[%c3_115, %c0_116, %c0_117] : memref<4x8x32xbf16, #tpu.memory_space<vmem>>, vector<1x8x32xbf16>
    %193 = vector.shape_cast %192 : vector<1x8x32xbf16> to vector<8x32xbf16>
    %cst_118 = arith.constant dense<0.000000e+00> : vector<16x32xf32>
    %194 = tpu.matmul %191, %193, %cst_118 {dimension_numbers = #tpu.dot_dimension_numbers<[1], [0], [0], [1], [0, 0, 1, 1], [], []>} : vector<16x8xbf16>, vector<8x32xbf16>, vector<16x32xf32> -> vector<16x32xf32>
    %195 = arith.addf %147, %194 : vector<16x32xf32>
    %c0_119 = arith.constant 0 : index
    %c0_120 = arith.constant 0 : index
    %196 = vector.load %arg8[%c0_119, %c0_120] : memref<1x32xf32, #tpu.memory_space<vmem>>, vector<1x32xf32>
    %197 = vector.broadcast %196 : vector<1x32xf32> to vector<16x32xf32>
    %198 = arith.addf %195, %197 : vector<16x32xf32>
    %199 = arith.addf %1, %198 : vector<16x32xf32>
    %cst_121 = arith.constant dense<0.000000e+00> : vector<16xf32>
    %200 = vector.multi_reduction <add>, %199, %cst_121 [1] : vector<16x32xf32> to vector<16xf32>
    %201 = vector.shape_cast %200 : vector<16xf32> to vector<16x1xf32>
    %cst_122 = arith.constant 3.200000e+01 : f32
    %202 = vector.broadcast %cst_122 : f32 to vector<16x1xf32>
    %203 = arith.divf %201, %202 : vector<16x1xf32>
    %204 = vector.broadcast %203 : vector<16x1xf32> to vector<16x32xf32>
    %205 = arith.subf %199, %204 : vector<16x32xf32>
    %206 = arith.mulf %205, %205 : vector<16x32xf32>
    %cst_123 = arith.constant dense<0.000000e+00> : vector<16xf32>
    %207 = vector.multi_reduction <add>, %206, %cst_123 [1] : vector<16x32xf32> to vector<16xf32>
    %208 = vector.shape_cast %207 : vector<16xf32> to vector<16x1xf32>
    %cst_124 = arith.constant 3.200000e+01 : f32
    %209 = vector.broadcast %cst_124 : f32 to vector<16x1xf32>
    %210 = arith.divf %208, %209 : vector<16x1xf32>
    %211 = vector.broadcast %203 : vector<16x1xf32> to vector<16x32xf32>
    %212 = arith.subf %199, %211 : vector<16x32xf32>
    %cst_125 = arith.constant 9.99999974E-6 : f32
    %213 = vector.broadcast %cst_125 : f32 to vector<16x1xf32>
    %214 = arith.addf %210, %213 : vector<16x1xf32>
    %215 = math.rsqrt %214 : vector<16x1xf32>
    %216 = vector.broadcast %215 : vector<16x1xf32> to vector<16x32xf32>
    %217 = arith.mulf %212, %216 : vector<16x32xf32>
    %c0_126 = arith.constant 0 : index
    %c0_127 = arith.constant 0 : index
    %218 = vector.load %arg9[%c0_126, %c0_127] : memref<1x32xf32, #tpu.memory_space<vmem>>, vector<1x32xf32>
    %219 = vector.broadcast %218 : vector<1x32xf32> to vector<16x32xf32>
    %220 = arith.mulf %217, %219 : vector<16x32xf32>
    %c0_128 = arith.constant 0 : index
    %c0_129 = arith.constant 0 : index
    %221 = vector.load %arg10[%c0_128, %c0_129] : memref<1x32xf32, #tpu.memory_space<vmem>>, vector<1x32xf32>
    %222 = vector.broadcast %221 : vector<1x32xf32> to vector<16x32xf32>
    %223 = arith.addf %220, %222 : vector<16x32xf32>
    %224 = arith.truncf %223 : vector<16x32xf32> to vector<16x32xbf16>
    %c0_130 = arith.constant 0 : index
    %c0_131 = arith.constant 0 : index
    %225 = vector.load %arg11[%c0_130, %c0_131] : memref<32x64xbf16, #tpu.memory_space<vmem>>, vector<32x64xbf16>
    %cst_132 = arith.constant dense<0.000000e+00> : vector<16x64xf32>
    %226 = tpu.matmul %224, %225, %cst_132 {dimension_numbers = #tpu.dot_dimension_numbers<[1], [0], [0], [1], [0, 0, 1, 1], [], []>} : vector<16x32xbf16>, vector<32x64xbf16>, vector<16x64xf32> -> vector<16x64xf32>
    %c0_133 = arith.constant 0 : index
    %c0_134 = arith.constant 0 : index
    %227 = vector.load %arg12[%c0_133, %c0_134] : memref<1x64xf32, #tpu.memory_space<vmem>>, vector<1x64xf32>
    %228 = vector.broadcast %227 : vector<1x64xf32> to vector<16x64xf32>
    %229 = arith.addf %226, %228 : vector<16x64xf32>
    %cst_135 = arith.constant 0.000000e+00 : f32
    %230 = vector.broadcast %cst_135 : f32 to vector<16x64xf32>
    %231 = arith.maximumf %229, %230 : vector<16x64xf32>
    %232 = arith.truncf %231 : vector<16x64xf32> to vector<16x64xbf16>
    %c0_136 = arith.constant 0 : index
    %c0_137 = arith.constant 0 : index
    %233 = vector.load %arg13[%c0_136, %c0_137] : memref<64x32xbf16, #tpu.memory_space<vmem>>, vector<64x32xbf16>
    %cst_138 = arith.constant dense<0.000000e+00> : vector<16x32xf32>
    %234 = tpu.matmul %232, %233, %cst_138 {dimension_numbers = #tpu.dot_dimension_numbers<[1], [0], [0], [1], [0, 0, 1, 1], [], []>} : vector<16x64xbf16>, vector<64x32xbf16>, vector<16x32xf32> -> vector<16x32xf32>
    %c0_139 = arith.constant 0 : index
    %c0_140 = arith.constant 0 : index
    %235 = vector.load %arg14[%c0_139, %c0_140] : memref<1x32xf32, #tpu.memory_space<vmem>>, vector<1x32xf32>
    %236 = vector.broadcast %235 : vector<1x32xf32> to vector<16x32xf32>
    %237 = arith.addf %234, %236 : vector<16x32xf32>
    %238 = arith.addf %223, %237 : vector<16x32xf32>
    %cst_141 = arith.constant dense<0.000000e+00> : vector<16xf32>
    %239 = vector.multi_reduction <add>, %238, %cst_141 [1] : vector<16x32xf32> to vector<16xf32>
    %240 = vector.shape_cast %239 : vector<16xf32> to vector<16x1xf32>
    %cst_142 = arith.constant 3.200000e+01 : f32
    %241 = vector.broadcast %cst_142 : f32 to vector<16x1xf32>
    %242 = arith.divf %240, %241 : vector<16x1xf32>
    %243 = vector.broadcast %242 : vector<16x1xf32> to vector<16x32xf32>
    %244 = arith.subf %238, %243 : vector<16x32xf32>
    %245 = arith.mulf %244, %244 : vector<16x32xf32>
    %cst_143 = arith.constant dense<0.000000e+00> : vector<16xf32>
    %246 = vector.multi_reduction <add>, %245, %cst_143 [1] : vector<16x32xf32> to vector<16xf32>
    %247 = vector.shape_cast %246 : vector<16xf32> to vector<16x1xf32>
    %cst_144 = arith.constant 3.200000e+01 : f32
    %248 = vector.broadcast %cst_144 : f32 to vector<16x1xf32>
    %249 = arith.divf %247, %248 : vector<16x1xf32>
    %250 = vector.broadcast %242 : vector<16x1xf32> to vector<16x32xf32>
    %251 = arith.subf %238, %250 : vector<16x32xf32>
    %cst_145 = arith.constant 9.99999974E-6 : f32
    %252 = vector.broadcast %cst_145 : f32 to vector<16x1xf32>
    %253 = arith.addf %249, %252 : vector<16x1xf32>
    %254 = math.rsqrt %253 : vector<16x1xf32>
    %255 = vector.broadcast %254 : vector<16x1xf32> to vector<16x32xf32>
    %256 = arith.mulf %251, %255 : vector<16x32xf32>
    %c0_146 = arith.constant 0 : index
    %c0_147 = arith.constant 0 : index
    %257 = vector.load %arg15[%c0_146, %c0_147] : memref<1x32xf32, #tpu.memory_space<vmem>>, vector<1x32xf32>
    %258 = vector.broadcast %257 : vector<1x32xf32> to vector<16x32xf32>
    %259 = arith.mulf %256, %258 : vector<16x32xf32>
    %c0_148 = arith.constant 0 : index
    %c0_149 = arith.constant 0 : index
    %260 = vector.load %arg16[%c0_148, %c0_149] : memref<1x32xf32, #tpu.memory_space<vmem>>, vector<1x32xf32>
    %261 = vector.broadcast %260 : vector<1x32xf32> to vector<16x32xf32>
    %262 = arith.addf %259, %261 : vector<16x32xf32>
    %c0_150 = arith.constant 0 : index
    %c0_151 = arith.constant 0 : index
    %263 = vector.load %arg17[%c0_150, %c0_151] : memref<16x32xf32, #tpu.memory_space<vmem>>, vector<16x32xf32>
    tpu.vector_store %arg17[%c0_150, %c0_151], %262 {strides = array<i32>} : memref<16x32xf32, #tpu.memory_space<vmem>>, vector<16x32xf32>,
    return
  }
}

</mosaic_0001>

<bundles_post_ra>
// kernel: tpu_custom_call.1
= control target key start
LH: loop header
LB: loop body
LE: loop exit
PB: predicated region body
PF: predicated region fallthrough
CT: control target
= control target key end

     0   :  { %s3257_s0 = inlined_call_operand.vmem [shape: f32[2,8,32], index: 0, kind: input, shape index: {}]   ;;  %s3258_s1 = inlined_call_operand.vmem [shape: bf16[4,32,8], index: 1, kind: input, shape index: {}]   ;;  %s3259_s2 = inlined_call_operand.vmem [shape: f32[4,1,8], index: 2, kind: input, shape index: {}]   ;;  %s3260_s3 = inlined_call_operand.vmem [shape: bf16[4,32,8], index: 3, kind: input, shape index: {}]   ;;  %s3261_s4 = inlined_call_operand.vmem [shape: f32[4,1,8], index: 4, kind: input, shape index: {}]   ;;  %s3262_s5 = inlined_call_operand.vmem [shape: bf16[4,32,8], index: 5, kind: input, shape index: {}]   ;;  %s3263_s6 = inlined_call_operand.vmem [shape: f32[4,1,8], index: 6, kind: input, shape index: {}]   ;;  %s3264_s7 = inlined_call_operand.vmem [shape: bf16[4,8,32], index: 7, kind: input, shape index: {}]   ;;  %s3265_s8 = inlined_call_operand.vmem [shape: f32[1,32], index: 8, kind: input, shape index: {}]   ;;  %s3266_s9 = inlined_call_operand.vmem [shape: f32[1,32], index: 9, kind: input, shape index: {}]   ;;  %s3267_s10 = inlined_call_operand.vmem [shape: f32[1,32], index: 10, kind: input, shape index: {}]   ;;  %s3268_s11 = inlined_call_operand.vmem [shape: bf16[32,64], index: 11, kind: input, shape index: {}]   ;;  %s3269_s12 = inlined_call_operand.vmem [shape: f32[1,64], index: 12, kind: input, shape index: {}]   ;;  %s3270_s13 = inlined_call_operand.vmem [shape: bf16[64,32], index: 13, kind: input, shape index: {}]   ;;  %s3271_s14 = inlined_call_operand.vmem [shape: f32[1,32], index: 14, kind: input, shape index: {}]   ;;  %s3272_s15 = inlined_call_operand.vmem [shape: f32[1,32], index: 15, kind: input, shape index: {}]   ;;  %s3273_s16 = inlined_call_operand.vmem [shape: f32[1,32], index: 16, kind: input, shape index: {}]   ;;  %s3274_s17 = inlined_call_operand.hbm [shape: f32[16,32], index: 17, kind: output, shape index: {}]  }
   0x1   :  { %3277 = sst [smem:[#allocation5_spill]] %s3257_s0 }
   0x2   :  { %3278 = sst [smem:[#allocation6_spill]] %s3258_s1 }
   0x3   :  { %v2651_v0 = vld [vmem:[%s3260_s3] sm:$0xff]   ;;  %v2747_v1 = vmov 0.0   ;;  %v2652_v2 = vld [vmem:[%s3260_s3 + $0x8] sm:$0xff]   ;;  %s3279_s0 = sld [smem:[#allocation6_spill]]  ;;  %vm2748_vm0 = vmmov 0   ;;  %s3280_s19 = sld [smem:[#allocation5_spill]] }
   0x4   :  { %2418 = vmatprep.subr.bf16.mxu1 %v2747_v1  ;;  %2410 = vmatprep.subr.bf16.mxu0 %v2747_v1  ;;  %vm84_vm1 = vcmask 261120   ;;  %v2655_v8 = vld [vmem:[%s3262_s5] sm:$0xff]   ;;  %v2656_v9 = vld [vmem:[%s3262_s5 + $0x8] sm:$0xff]  }
   0x5   :  { %2419 = vmatpush3.bf16.msra.mxu1 %v2651_v0  ;;  %2422 = vmatprep.mubr.msk.bf16.mxu1 %vm2748_vm0, %v2747_v1 }
   0x6   :  { %2420 = vmatprep.subr.bf16.mxu1 %v2747_v1  ;;  %2414 = vmatprep.mubr.msk.bf16.mxu0 %vm2748_vm0, %v2747_v1 }
   0x9   :  { %v2653_v3 = vld [vmem:[%s3279_s0] sm:$0xff]   ;;  %v59_v5 = vld [vmem:[%s3280_s19 + $0x8] sm:$0xff]  ;;  %2421 = vmatpush3.bf16.msra.mxu1 %v2652_v2 }
   0xa   :  { %v58_v4 = vld [vmem:[%s3280_s19] sm:$0xff]  ;;  %2411 = vmatpush3.bf16.msra.mxu0 %v2653_v3  ;;  %v2654_v6 = vld [vmem:[%s3279_s0 + $0x8] sm:$0xff]   ;;  %2434 = vmatprep.subr.bf16.mxu1 %v2747_v1 }
   0xb   :  { %v2867_v7 = vpack.c.bf16 %v59_v5, %v58_v4  ;;  %2412 = vmatprep.subr.bf16.mxu0 %v2747_v1 }
   0xd   :  { %2423 = vmatmul.mubr.msk.bf16.vlgmr.msra.gmra.mrb[0].mxu1 %vm84_vm1, %v2867_v7 }
   0xe   :  { %2413 = vmatpush3.bf16.msra.mxu0 %v2654_v6  ;;  %2436 = vmatprep.mubr.msk.bf16.mxu1 %vm2748_vm0, %v2747_v1 }
   0xf   :  { %2426 = vmatprep.subr.bf16.mxu0 %v2747_v1 }
  0x11   :  { %2415 = vmatmul.mubr.msk.bf16.vlgmr.msra.gmra.mrb[0].mxu0 %vm84_vm1, %v2867_v7 }
  0x12   :  { %2427 = vmatpush3.bf16.msra.mxu0 %v2655_v8  ;;  %2430 = vmatprep.mubr.msk.bf16.mxu0 %vm2748_vm0, %v2747_v1 }
  0x13   :  { %2428 = vmatprep.subr.bf16.mxu0 %v2747_v1 }
  0x16   :  { %2429 = vmatpush3.bf16.msra.mxu0 %v2656_v9 }
  0x17   :  { %2440 = vmatprep.subr.bf16.mxu0 %v2747_v1 }
  0x19   :  { %2431 = vmatmul.mubr.msk.bf16.vlgmr.msra.gmra.mrb[4].mxu0 %vm84_vm1, %v2867_v7 }
  0x1a   :  { %2442 = vmatprep.mubr.msk.bf16.mxu0 %vm2748_vm0, %v2747_v1 }
  0x1b   :  { %22 = vsyncpa [#allocation3], 0  ;;  %v2199_v10 = vld [vmem:[%s3261_s4] ss:$0 sm:$0xff]  ;;  %vm263_vm2 = vcmask 64512   ;;  %vm385_vm3 = vcmask 1043456  }
  0x1c   :  { %v2195_v15 = vld [vmem:[%s3259_s2] ss:$0 sm:$0xff]  ;;  %v2657_v4 = vld [vmem:[%s3260_s3 + $0x10] sm:$0xff]   ;;  %v2658_v9 = vld [vmem:[%s3260_s3 + $0x18] sm:$0xff]   ;;  %vm2086_vm4 = vcmask 523264   ;;  %s2749_s25 = smov [#allocation2]  }
  0x1d   :  { %v2203_v27 = vld [vmem:[%s3263_s6] ss:$0 sm:$0xff]  ;;  %s2184_s26 = sshll.u32 %s2749_s25, 4  ;;  %s2185_s26 = int_to_ptr.vmem [resolvable:$true] %s2184_s26 }
  0x1e   :  { %s2723_s27 = scalar_lea.vmem %s2185_s26, 256  ;;  %p2728_p1 = scmp.lt.s32.totalorder %s2185_s26, %s2185_s26 }
  0x1f   :  { %p2724_p0 = scmp.ne.s32.totalorder %s2185_s26, %s2723_s27  ;;  %p2729_p2 = scmp.lt.s32.totalorder %s2723_s27, %s2723_s27 }
  0x21   :  { %p2730_p3 = por %p2729_p2, %p2728_p1 }
  0x23   :  { %p2731_p4 = pnand %p2730_p3, %p2724_p0 }
  0xe0   :  { %v186_v11 = vpop.f32.mrb[0].mxu1 }
  0xe1   :  { %v187_v12 = vadd.f32 %v2199_v10, %v186_v11  ;;  %v2424_v13 = vpop.f32.mrb[1].mxu1 }
  0xe2   :  { %v189_v14 = vpop.f32.mrb[2].mxu1  ;;  %v2661_v13 = vld [vmem:[%s3262_s5 + $0x10] sm:$0xff]  }
  0xe3   :  { %v259_v17 = vpack.c.bf16 %v187_v12, %v187_v12  ;;  %v190_v18 = vadd.f32 %v2199_v10, %v189_v14  ;;  %v2425_v19 = vpop.f32.mrb[3].mxu1  ;;  %v2659_v10 = vld [vmem:[%s3279_s0 + $0x10] sm:$0xff]   ;;  %v2660_v12 = vld [vmem:[%s3279_s0 + $0x18] sm:$0xff]  }
  0xe4   :  { %v122_v16 = vpop.f32.mrb[0].mxu0  ;;  %v2662_v14 = vld [vmem:[%s3262_s5 + $0x18] sm:$0xff]  }
  0xe5   :  { %v2416_v20 = vpop.f32.mrb[1].mxu0  ;;  %v268_v22 = vsel %vm263_vm2, %v259_v17, 0  ;;  %v260_v23 = vpack.c.bf16 %v190_v18, %v190_v18  ;;  %v123_v24 = vadd.f32 %v2195_v15, %v122_v16 }
  0xe6   :  { %v125_v21 = vpop.f32.mrb[2].mxu0  ;;  %2435 = vmatpush3.bf16.xpose.msra.mxu1 %v268_v22 }
  0xe7   :  { %v2417_v25 = vpop.f32.mrb[3].mxu0  ;;  %v314_v26 = vsel %vm263_vm2, %v260_v23, 0  ;;  %2446 = vmatprep.subr.bf16.mxu1 %v2747_v1  ;;  %v257_v28 = vpack.c.bf16 %v123_v24, %v123_v24  ;;  %v126_v29 = vadd.f32 %v2195_v15, %v125_v21  ;;  %v2225_v23 = vld [vmem:[%s3261_s4 + $0x1] ss:$0 sm:$0xff] }
  0xe8   :  { %2441 = vmatpush3.bf16.xpose.msra.mxu0 %v314_v26 }
  0xe9   :  { %2452 = vmatprep.subr.bf16.mxu0 %v2747_v1  ;;  %v258_v34 = vpack.c.bf16 %v126_v29, %v126_v29  ;;  %v2216_v29 = vld [vmem:[%s3259_s2 + $0x1] ss:$0 sm:$0xff] }
  0xec   :  { %v250_v30 = vpop.f32.mrb[4].mxu0 }
  0xed   :  { %v251_v31 = vadd.f32 %v2203_v27, %v250_v30  ;;  %v2432_v32 = vpop.f32.mrb[5].mxu0  ;;  %2437 = vmatmul.mubr.msk.bf16.vlgmr.msra.gmra.mrb[4].mxu1 %vm263_vm2, %v257_v28 }
  0xee   :  { %v253_v33 = vpop.f32.mrb[6].mxu0  ;;  %2448 = vmatprep.mubr.msk.bf16.mxu1 %vm2748_vm0, %v2747_v1 }
  0xef   :  { %v261_v35 = vpack.c.bf16 %v251_v31, %v251_v31  ;;  %v254_v36 = vadd.f32 %v2203_v27, %v253_v33  ;;  %v2433_v37 = vpop.f32.mrb[7].mxu0  ;;  %2443 = vmatmul.mubr.msk.bf16.vlgmr.msra.gmra.mrb[8].mxu0 %vm263_vm2, %v258_v34 }
  0xf0   :  { %2454 = vmatprep.mubr.msk.bf16.mxu0 %vm2748_vm0, %v2747_v1 }
  0xf1   :  { %v387_v38 = vsel %vm385_vm3, %v261_v35, 0  ;;  %v262_v39 = vpack.c.bf16 %v254_v36, %v254_v36 }
  0xf2   :  { %2447 = vmatpush3.bf16.msra.mxu1 %v387_v38 }
  0xf3   :  { %v433_v40 = vsel %vm385_vm3, %v262_v39, 0  ;;  %2458 = vmatprep.subr.bf16.mxu1 %v2747_v1 }
  0xf4   :  { %2453 = vmatpush3.bf16.msra.mxu0 %v433_v40 }
  0xf5   :  { %2466 = vmatprep.subr.bf16.mxu0 %v2747_v1 }
 0x1c0   :  { %v304_v41 = vpop.f32.mrb[4].mxu1 }
 0x1c1   :  { %v2438_v42 = vpop.f32.mrb[5].mxu1  ;;  %v356_v49 = vmul.f32 0.35355338, %v304_v41 }
 0x1c2   :  { %v307_v43 = vpop.f32.mrb[6].mxu1  ;;  %v350_v44 = vpop.f32.mrb[8].mxu0 }
 0x1c3   :  { %v357_v45 = vmul.f32 0.35355338, %v350_v44  ;;  %v2439_v46 = vpop.f32.mrb[7].mxu1  ;;  %v2444_v47 = vpop.f32.mrb[9].mxu0  ;;  %v358_v52 = vsel %vm263_vm2, %v356_v49, -inf }
 0x1c4   :  { %v353_v48 = vpop.f32.mrb[10].mxu0  ;;  %v2234_v44 = vld [vmem:[%s3263_s6 + $0x1] ss:$0 sm:$0xff] }
 0x1c5   :  { %v2445_v50 = vpop.f32.mrb[11].mxu0  ;;  %v361_v51 = vsel %vm263_vm2, %v357_v45, -inf }
 0x1c6   :  { %362 = vmax.xlane.f32.xlu0 %v361_v51 }
 0x1ca   :  { %359 = vmax.xlane.f32.xlu0 %v358_v52 }
 0x253   :  { %v363_v53 = vpop.xlane.xlu0 %362 }
 0x254   :  { %v365_v54 = vsub.f32 %v357_v45, %v363_v53 }
 0x256   :  { %v368_v55 = vmul.f32 1.442695, %v365_v54 }
 0x257   :  { %v360_v56 = vpop.xlane.xlu0 %359 }
 0x258   :  { %2681 = vpow2.f32 %v368_v55  ;;  %v364_v57 = vsub.f32 %v356_v49, %v360_v56 }
 0x25a   :  { %v366_v58 = vmul.f32 1.442695, %v364_v57 }
 0x25c   :  { %2683 = vpow2.f32 %v366_v58 }
 0x262   :  { %v2682_v59 = vpop.eup %2681 }
 0x263   :  { %v373_v60 = vsel %vm263_vm2, %v2682_v59, 0.0 }
 0x264   :  { %374 = vadd.xlane.f32.xlu1 %v373_v60 }
 0x266   :  { %v2684_v61 = vpop.eup %2683 }
 0x267   :  { %v370_v62 = vsel %vm263_vm2, %v2684_v61, 0.0 }
 0x268   :  { %371 = vadd.xlane.f32.xlu1 %v370_v62 }
 0x2f1   :  { %v375_v63 = vpop.xlane.xlu1 %374 }
 0x2f2   :  { %2685 = vrcp.f32 %v375_v63 }
 0x2f5   :  { %v372_v0 = vpop.xlane.xlu1 %371 }
 0x2f6   :  { %2687 = vrcp.f32 %v372_v0 }
 0x2fc   :  { %v2686_v2 = vpop.eup %2685 }
 0x2fd   :  { %v379_v3 = vmul.f32 %v2686_v2, %v2682_v59 }
 0x2ff   :  { %v381_v5 = vpack.c.bf16 %v379_v3, %v379_v3 }
 0x300   :  { %v2688_v6 = vpop.eup %2687 }
 0x301   :  { %v378_v8 = vmul.f32 %v2688_v6, %v2684_v61  ;;  %2455 = vmatmul.mubr.msk.bf16.vlgmr.msra.gmra.mrb[12].mxu0 %vm263_vm2, %v381_v5 }
 0x302   :  { %2467 = vmatpush3.bf16.msra.mxu0 %v2657_v4  ;;  %2470 = vmatprep.mubr.msk.bf16.mxu0 %vm2748_vm0, %v2747_v1 }
 0x303   :  { %v380_v11 = vpack.c.bf16 %v378_v8, %v378_v8  ;;  %2468 = vmatprep.subr.bf16.mxu0 %v2747_v1 }
 0x305   :  { %2449 = vmatmul.mubr.msk.bf16.vlgmr.msra.gmra.mrb[8].mxu1 %vm263_vm2, %v380_v11 }
 0x306   :  { %2469 = vmatpush3.bf16.msra.mxu0 %v2658_v9  ;;  %2459 = vmatpush3.bf16.msra.mxu1 %v2659_v10 }
 0x307   :  { %2460 = vmatprep.subr.bf16.mxu1 %v2747_v1  ;;  %2462 = vmatprep.mubr.msk.bf16.mxu1 %vm2748_vm0, %v2747_v1 }
 0x308   :  { %2482 = vmatprep.subr.bf16.mxu0 %v2747_v1 }
 0x309   :  { %2471 = vmatmul.mubr.msk.bf16.vlgmr.msra.gmra.mrb[16].mxu0 %vm84_vm1, %v2867_v7 }
 0x30a   :  { %2461 = vmatpush3.bf16.msra.mxu1 %v2660_v12  ;;  %2484 = vmatprep.mubr.msk.bf16.mxu0 %vm2748_vm0, %v2747_v1 }
 0x30b   :  { %2474 = vmatprep.subr.bf16.mxu1 %v2747_v1 }
 0x30d   :  { %2463 = vmatmul.mubr.msk.bf16.vlgmr.msra.gmra.mrb[12].mxu1 %vm84_vm1, %v2867_v7 }
 0x30e   :  { %2478 = vmatprep.mubr.msk.bf16.mxu1 %vm2748_vm0, %v2747_v1  ;;  %2475 = vmatpush3.bf16.msra.mxu1 %v2661_v13 }
 0x30f   :  { %2476 = vmatprep.subr.bf16.mxu1 %v2747_v1 }
 0x312   :  { %2477 = vmatpush3.bf16.msra.mxu1 %v2662_v14 }
 0x313   :  { %2488 = vmatprep.subr.bf16.mxu1 %v2747_v1 }
 0x315   :  { %2479 = vmatmul.mubr.msk.bf16.vlgmr.msra.gmra.mrb[16].mxu1 %vm84_vm1, %v2867_v7 }
 0x316   :  { %2490 = vmatprep.mubr.msk.bf16.mxu1 %vm2748_vm0, %v2747_v1 }
 0x3d4   :  { %v2961_v15 = vpop.f32.mrb[12].mxu0 }
 0x3d5   :  { %v2456_v16 = vpop.f32.mrb[13].mxu0 }
 0x3d6   :  { %v472_v17 = vpop.f32.mrb[14].mxu0 }
 0x3d7   :  { %v2457_v18 = vpop.f32.mrb[15].mxu0 }
 0x3d8   :  { %v2963_v19 = vpop.f32.mrb[8].mxu1 }
 0x3d9   :  { %v475_v20 = vpack.c.bf16 %v2961_v15, %v2963_v19  ;;  %v2450_v21 = vpop.f32.mrb[9].mxu1 }
 0x3da   :  { %v426_v22 = vpop.f32.mrb[10].mxu1  ;;  %v2242_v21 = vld [vmem:[%s3264_s7 + $0x4] sm:$0xf] }
 0x3db   :  { %v2451_v24 = vpop.f32.mrb[11].mxu1 }
 0x3dc   :  { %v602_v25 = vpop.f32.mrb[16].mxu0  ;;  %v476_v24 = vld [vmem:[%s3264_s7] sm:$0xf] }
 0x3dd   :  { %v603_v26 = vadd.f32 %v2225_v23, %v602_v25  ;;  %v2472_v27 = vpop.f32.mrb[17].mxu0 }
 0x3de   :  { %v605_v28 = vpop.f32.mrb[18].mxu0  ;;  %v898_v27 = vsel %vm385_vm3, %v2242_v21, 0 }
 0x3df   :  { %v677_v30 = vpack.c.bf16 %v603_v26, %v603_v26  ;;  %v606_v31 = vadd.f32 %v2225_v23, %v605_v28  ;;  %v2473_v32 = vpop.f32.mrb[19].mxu0 }
 0x3e0   :  { %v536_v33 = vpop.f32.mrb[12].mxu1 }
 0x3e1   :  { %v685_v34 = vsel %vm263_vm2, %v677_v30, 0  ;;  %v678_v35 = vpack.c.bf16 %v606_v31, %v606_v31  ;;  %v537_v36 = vadd.f32 %v2216_v29, %v536_v33  ;;  %v2464_v37 = vpop.f32.mrb[13].mxu1  ;;  %v2663_v30 = vld [vmem:[%s3260_s3 + $0x20] sm:$0xff]   ;;  %v2664_v31 = vld [vmem:[%s3260_s3 + $0x28] sm:$0xff]  }
 0x3e2   :  { %2483 = vmatpush3.bf16.xpose.msra.mxu0 %v685_v34  ;;  %v539_v38 = vpop.f32.mrb[14].mxu1  ;;  %v2665_v33 = vld [vmem:[%s3279_s0 + $0x20] sm:$0xff]  }
 0x3e3   :  { %v731_v39 = vsel %vm263_vm2, %v678_v35, 0  ;;  %v2465_v40 = vpop.f32.mrb[15].mxu1  ;;  %2494 = vmatprep.subr.bf16.mxu0 %v2747_v1  ;;  %v675_v41 = vpack.c.bf16 %v537_v36, %v537_v36  ;;  %v540_v42 = vadd.f32 %v2216_v29, %v539_v38  ;;  %v945_v29 = vsel %vm385_vm3, %v476_v24, 0 }
 0x3e4   :  { %2489 = vmatpush3.bf16.xpose.msra.mxu1 %v731_v39  ;;  %v2666_v39 = vld [vmem:[%s3279_s0 + $0x28] sm:$0xff]  }
 0x3e5   :  { %2500 = vmatprep.subr.bf16.mxu1 %v2747_v1  ;;  %v676_v43 = vpack.c.bf16 %v540_v42, %v540_v42 }
 0x3e8   :  { %v668_v45 = vpop.f32.mrb[16].mxu1 }
 0x3e9   :  { %2485 = vmatmul.mubr.msk.bf16.vlgmr.msra.gmra.mrb[20].mxu0 %vm263_vm2, %v675_v41  ;;  %v669_v46 = vadd.f32 %v2234_v44, %v668_v45  ;;  %v2480_v47 = vpop.f32.mrb[17].mxu1  ;;  %v2667_v41 = vld [vmem:[%s3262_s5 + $0x20] sm:$0xff]   ;;  %v2668_v45 = vld [vmem:[%s3262_s5 + $0x28] sm:$0xff]  }
 0x3ea   :  { %2496 = vmatprep.mubr.msk.bf16.mxu0 %vm2748_vm0, %v2747_v1  ;;  %v671_v48 = vpop.f32.mrb[18].mxu1 }
 0x3eb   :  { %2491 = vmatmul.mubr.msk.bf16.vlgmr.msra.gmra.mrb[20].mxu1 %vm263_vm2, %v676_v43  ;;  %v679_v49 = vpack.c.bf16 %v669_v46, %v669_v46  ;;  %v672_v50 = vadd.f32 %v2234_v44, %v671_v48  ;;  %v2481_v51 = vpop.f32.mrb[19].mxu1  ;;  %v2259_v46 = vld [vmem:[%s3261_s4 + $0x2] ss:$0 sm:$0xff] }
 0x3ec   :  { %2502 = vmatprep.mubr.msk.bf16.mxu1 %vm2748_vm0, %v2747_v1 }
 0x3ed   :  { %v803_v52 = vsel %vm385_vm3, %v679_v49, 0  ;;  %v680_v53 = vpack.c.bf16 %v672_v50, %v672_v50 }
 0x3ee   :  { %2495 = vmatpush3.bf16.msra.mxu0 %v803_v52 }
 0x3ef   :  { %v849_v54 = vsel %vm385_vm3, %v680_v53, 0  ;;  %2506 = vmatprep.subr.bf16.mxu0 %v2747_v1 }
 0x3f0   :  { %2501 = vmatpush3.bf16.msra.mxu1 %v849_v54 }
 0x3f1   :  { %2512 = vmatprep.subr.bf16.mxu1 %v2747_v1 }
 0x4bc   :  { %v721_v55 = vpop.f32.mrb[20].mxu0 }
 0x4bd   :  { %v773_v56 = vmul.f32 0.35355338, %v721_v55  ;;  %v2486_v57 = vpop.f32.mrb[21].mxu0 }
 0x4be   :  { %v724_v58 = vpop.f32.mrb[22].mxu0  ;;  %v767_v59 = vpop.f32.mrb[20].mxu1 }
 0x4bf   :  { %v774_v60 = vmul.f32 0.35355338, %v767_v59  ;;  %v2487_v61 = vpop.f32.mrb[23].mxu0  ;;  %v2492_v62 = vpop.f32.mrb[21].mxu1  ;;  %v775_v63 = vsel %vm263_vm2, %v773_v56, -inf }
 0x4c0   :  { %v770_v0 = vpop.f32.mrb[22].mxu1  ;;  %776 = vmax.xlane.f32.xlu0 %v775_v63  ;;  %v2250_v63 = vld [vmem:[%s3259_s2 + $0x2] ss:$0 sm:$0xff] }
 0x4c1   :  { %v2493_v2 = vpop.f32.mrb[23].mxu1  ;;  %v778_v3 = vsel %vm263_vm2, %v774_v60, -inf }
 0x4c2   :  { %779 = vmax.xlane.f32.xlu1 %v778_v3 }
 0x54d   :  { %v777_v4 = vpop.xlane.xlu0 %776 }
 0x54e   :  { %v781_v5 = vsub.f32 %v773_v56, %v777_v4 }
 0x54f   :  { %v780_v6 = vpop.xlane.xlu1 %779 }
 0x550   :  { %v783_v8 = vmul.f32 1.442695, %v781_v5  ;;  %v782_v9 = vsub.f32 %v774_v60, %v780_v6 }
 0x552   :  { %2689 = vpow2.f32 %v783_v8  ;;  %v785_v10 = vmul.f32 1.442695, %v782_v9 }
 0x554   :  { %2691 = vpow2.f32 %v785_v10  ;;  %v2268_v10 = vld [vmem:[%s3263_s6 + $0x2] ss:$0 sm:$0xff] }
 0x55c   :  { %v2690_v11 = vpop.eup %2689 }
 0x55d   :  { %v787_v12 = vsel %vm263_vm2, %v2690_v11, 0.0 }
 0x55e   :  { %v2692_v13 = vpop.eup %2691  ;;  %788 = vadd.xlane.f32.xlu0 %v787_v12 }
 0x55f   :  { %v790_v14 = vsel %vm263_vm2, %v2692_v13, 0.0 }
 0x560   :  { %791 = vadd.xlane.f32.xlu1 %v790_v14 }
 0x5eb   :  { %v789_v16 = vpop.xlane.xlu0 %788 }
 0x5ec   :  { %2693 = vrcp.f32 %v789_v16 }
 0x5ed   :  { %v792_v17 = vpop.xlane.xlu1 %791 }
 0x5ee   :  { %2695 = vrcp.f32 %v792_v17 }
 0x5f6   :  { %v2694_v18 = vpop.eup %2693 }
 0x5f7   :  { %v795_v22 = vmul.f32 %v2694_v18, %v2690_v11 }
 0x5f8   :  { %v2696_v23 = vpop.eup %2695 }
 0x5f9   :  { %v796_v25 = vmul.f32 %v2696_v23, %v2692_v13  ;;  %v797_v26 = vpack.c.bf16 %v795_v22, %v795_v22 }
 0x5fb   :  { %2497 = vmatmul.mubr.msk.bf16.vlgmr.msra.gmra.mrb[24].mxu0 %vm263_vm2, %v797_v26  ;;  %v798_v28 = vpack.c.bf16 %v796_v25, %v796_v25 }
 0x5fc   :  { %2507 = vmatpush3.bf16.msra.mxu0 %v898_v27  ;;  %2508 = vmatprep.mubr.msk.bf16.mxu0 %vm2748_vm0, %v2747_v1 }
 0x5fd   :  { %2503 = vmatmul.mubr.msk.bf16.vlgmr.msra.gmra.mrb[24].mxu1 %vm263_vm2, %v798_v28  ;;  %2518 = vmatprep.subr.bf16.mxu0 %v2747_v1 }
 0x5fe   :  { %2513 = vmatpush3.bf16.msra.mxu1 %v945_v29  ;;  %2514 = vmatprep.mubr.msk.bf16.mxu1 %vm2748_vm0, %v2747_v1 }
 0x5ff   :  { %2526 = vmatprep.subr.bf16.mxu1 %v2747_v1 }
 0x605   :  { %2515 = vmatmul.mubr.msk.bf16.vlgmr.msra.gmra.mrb[28].mxu1 %vm263_vm2, %v475_v20 }
 0x606   :  { %2527 = vmatpush3.bf16.msra.mxu1 %v2663_v30  ;;  %2530 = vmatprep.mubr.msk.bf16.mxu1 %vm2748_vm0, %v2747_v1 }
 0x607   :  { %2528 = vmatprep.subr.bf16.mxu1 %v2747_v1 }
 0x60a   :  { %2529 = vmatpush3.bf16.msra.mxu1 %v2664_v31 }
 0x60b   :  { %2542 = vmatprep.subr.bf16.mxu1 %v2747_v1 }
 0x60d   :  { %2531 = vmatmul.mubr.msk.bf16.vlgmr.msra.gmra.mrb[32].mxu1 %vm84_vm1, %v2867_v7 }
 0x60e   :  { %2544 = vmatprep.mubr.msk.bf16.mxu1 %vm2748_vm0, %v2747_v1 }
 0x6ce   :  { %v839_v15 = vpop.f32.mrb[24].mxu0 }
 0x6cf   :  { %v2498_v19 = vpop.f32.mrb[25].mxu0 }
 0x6d0   :  { %v842_v20 = vpop.f32.mrb[26].mxu0  ;;  %v885_v32 = vpop.f32.mrb[24].mxu1 }
 0x6d1   :  { %v891_v34 = vpack.c.bf16 %v885_v32, %v839_v15  ;;  %v2499_v35 = vpop.f32.mrb[27].mxu0  ;;  %v2504_v36 = vpop.f32.mrb[25].mxu1 }
 0x6d2   :  { %v888_v37 = vpop.f32.mrb[26].mxu1 }
 0x6d3   :  { %v2505_v38 = vpop.f32.mrb[27].mxu1  ;;  %2509 = vmatmul.mubr.msk.bf16.vlgmr.msra.gmra.mrb[28].mxu0 %vm263_vm2, %v891_v34 }
 0x6d4   :  { %2519 = vmatpush3.bf16.msra.mxu0 %v2665_v33  ;;  %2522 = vmatprep.mubr.msk.bf16.mxu0 %vm2748_vm0, %v2747_v1 }
 0x6d5   :  { %2520 = vmatprep.subr.bf16.mxu0 %v2747_v1 }
 0x6d8   :  { %v981_v40 = vpop.f32.mrb[28].mxu1  ;;  %2521 = vmatpush3.bf16.msra.mxu0 %v2666_v39 }
 0x6d9   :  { %v2516_v42 = vpop.f32.mrb[29].mxu1  ;;  %2534 = vmatprep.subr.bf16.mxu0 %v2747_v1 }
 0x6da   :  { %v984_v43 = vpop.f32.mrb[30].mxu1 }
 0x6db   :  { %v2517_v44 = vpop.f32.mrb[31].mxu1  ;;  %2523 = vmatmul.mubr.msk.bf16.vlgmr.msra.gmra.mrb[32].mxu0 %vm84_vm1, %v2867_v7 }
 0x6dc   :  { %2535 = vmatpush3.bf16.msra.mxu0 %v2667_v41  ;;  %2538 = vmatprep.mubr.msk.bf16.mxu0 %vm2748_vm0, %v2747_v1 }
 0x6dd   :  { %2536 = vmatprep.subr.bf16.mxu0 %v2747_v1 }
 0x6e0   :  { %v1113_v47 = vpop.f32.mrb[32].mxu1  ;;  %2537 = vmatpush3.bf16.msra.mxu0 %v2668_v45 }
 0x6e1   :  { %v1114_v48 = vadd.f32 %v2259_v46, %v1113_v47  ;;  %v2532_v49 = vpop.f32.mrb[33].mxu1  ;;  %2548 = vmatprep.subr.bf16.mxu0 %v2747_v1 }
 0x6e2   :  { %v1116_v50 = vpop.f32.mrb[34].mxu1 }
 0x6e3   :  { %v1188_v51 = vpack.c.bf16 %v1114_v48, %v1114_v48  ;;  %v1117_v52 = vadd.f32 %v2259_v46, %v1116_v50  ;;  %v2533_v53 = vpop.f32.mrb[35].mxu1  ;;  %2539 = vmatmul.mubr.msk.bf16.vlgmr.msra.gmra.mrb[36].mxu0 %vm84_vm1, %v2867_v7  ;;  %v2276_v46 = vld [vmem:[%s3264_s7 + $0x8] sm:$0xf] }
 0x6e4   :  { %2550 = vmatprep.mubr.msk.bf16.mxu0 %vm2748_vm0, %v2747_v1  ;;  %v2671_v53 = vld [vmem:[%s3279_s0 + $0x30] sm:$0xff]  }
 0x6e5   :  { %v1196_v54 = vsel %vm263_vm2, %v1188_v51, 0  ;;  %v1189_v55 = vpack.c.bf16 %v1117_v52, %v1117_v52  ;;  %v1409_v51 = vsel %vm385_vm3, %v2276_v46, 0 }
 0x6e6   :  { %2543 = vmatpush3.bf16.xpose.msra.mxu1 %v1196_v54  ;;  %v2672_v54 = vld [vmem:[%s3279_s0 + $0x38] sm:$0xff]  }
 0x6e7   :  { %v1242_v56 = vsel %vm263_vm2, %v1189_v55, 0  ;;  %2554 = vmatprep.subr.bf16.mxu1 %v2747_v1 }
 0x6e9   :  { %2549 = vmatpush3.bf16.xpose.msra.mxu0 %v1242_v56 }
 0x6ea   :  { %2560 = vmatprep.subr.bf16.mxu0 %v2747_v1 }
 0x7a6   :  { %v934_v57 = vpop.f32.mrb[28].mxu0 }
 0x7a7   :  { %v3062_v58 = vadd.f32 %v981_v40, %v934_v57  ;;  %v2510_v59 = vpop.f32.mrb[29].mxu0 }
 0x7a8   :  { %v937_v60 = vpop.f32.mrb[30].mxu0 }
 0x7a9   :  { %v3064_v61 = vadd.f32 %v984_v43, %v937_v60  ;;  %v2511_v62 = vpop.f32.mrb[31].mxu0  ;;  %v2669_v60 = vld [vmem:[%s3260_s3 + $0x30] sm:$0xff]  }
 0x7ae   :  { %v1047_v0 = vpop.f32.mrb[32].mxu0 }
 0x7af   :  { %v1048_v2 = vadd.f32 %v2250_v63, %v1047_v0  ;;  %v2524_v3 = vpop.f32.mrb[33].mxu0 }
 0x7b0   :  { %v1050_v4 = vpop.f32.mrb[34].mxu0 }
 0x7b1   :  { %v1186_v5 = vpack.c.bf16 %v1048_v2, %v1048_v2  ;;  %v1051_v6 = vadd.f32 %v2250_v63, %v1050_v4  ;;  %v2525_v8 = vpop.f32.mrb[35].mxu0  ;;  %v2670_v4 = vld [vmem:[%s3260_s3 + $0x38] sm:$0xff]  }
 0x7b3   :  { %v1187_v9 = vpack.c.bf16 %v1051_v6, %v1051_v6  ;;  %2545 = vmatmul.mubr.msk.bf16.vlgmr.msra.gmra.mrb[36].mxu1 %vm263_vm2, %v1186_v5  ;;  %v2673_v5 = vld [vmem:[%s3262_s5 + $0x30] sm:$0xff]   ;;  %v2674_v6 = vld [vmem:[%s3262_s5 + $0x38] sm:$0xff]  }
 0x7b4   :  { %2556 = vmatprep.mubr.msk.bf16.mxu1 %vm2748_vm0, %v2747_v1 }
 0x7b5   :  { %2551 = vmatmul.mubr.msk.bf16.vlgmr.msra.gmra.mrb[40].mxu0 %vm263_vm2, %v1187_v9 }
 0x7b6   :  { %v1179_v11 = vpop.f32.mrb[36].mxu0  ;;  %2562 = vmatprep.mubr.msk.bf16.mxu0 %vm2748_vm0, %v2747_v1 }
 0x7b7   :  { %v1180_v12 = vadd.f32 %v2268_v10, %v1179_v11  ;;  %v2540_v13 = vpop.f32.mrb[37].mxu0 }
 0x7b8   :  { %v1182_v14 = vpop.f32.mrb[38].mxu0 }
 0x7b9   :  { %v1190_v16 = vpack.c.bf16 %v1180_v12, %v1180_v12  ;;  %v1183_v17 = vadd.f32 %v2268_v10, %v1182_v14  ;;  %v2541_v18 = vpop.f32.mrb[39].mxu0 }
 0x7bb   :  { %v1314_v21 = vsel %vm385_vm3, %v1190_v16, 0  ;;  %v1191_v22 = vpack.c.bf16 %v1183_v17, %v1183_v17 }
 0x7bc   :  { %2555 = vmatpush3.bf16.msra.mxu1 %v1314_v21 }
 0x7bd   :  { %v1360_v23 = vsel %vm385_vm3, %v1191_v22, 0  ;;  %2566 = vmatprep.subr.bf16.mxu1 %v2747_v1 }
 0x7be   :  { %2561 = vmatpush3.bf16.msra.mxu0 %v1360_v23 }
 0x7bf   :  { %2572 = vmatprep.subr.bf16.mxu0 %v2747_v1 }
 0x886   :  { %v1232_v24 = vpop.f32.mrb[36].mxu1 }
 0x887   :  { %v1284_v25 = vmul.f32 0.35355338, %v1232_v24  ;;  %v2546_v26 = vpop.f32.mrb[37].mxu1 }
 0x888   :  { %v1235_v27 = vpop.f32.mrb[38].mxu1  ;;  %v1278_v28 = vpop.f32.mrb[40].mxu0 }
 0x889   :  { %v1285_v29 = vmul.f32 0.35355338, %v1278_v28  ;;  %v2547_v30 = vpop.f32.mrb[39].mxu1  ;;  %v2552_v31 = vpop.f32.mrb[41].mxu0  ;;  %v1286_v15 = vsel %vm263_vm2, %v1284_v25, -inf }
 0x88a   :  { %1287 = vmax.xlane.f32.xlu0 %v1286_v15  ;;  %v1281_v19 = vpop.f32.mrb[42].mxu0 }
 0x88b   :  { %v2553_v20 = vpop.f32.mrb[43].mxu0  ;;  %v1289_v32 = vsel %vm263_vm2, %v1285_v29, -inf }
 0x88c   :  { %1290 = vmax.xlane.f32.xlu1 %v1289_v32  ;;  %v2301_v20 = vld [vmem:[%s3263_s6 + $0x3] ss:$0 sm:$0xff] }
 0x917   :  { %v1288_v33 = vpop.xlane.xlu0 %1287 }
 0x918   :  { %v1292_v34 = vsub.f32 %v1284_v25, %v1288_v33  ;;  %v2283_v25 = vld [vmem:[%s3259_s2 + $0x3] ss:$0 sm:$0xff] }
 0x919   :  { %v1291_v35 = vpop.xlane.xlu1 %1290 }
 0x91a   :  { %v1294_v36 = vmul.f32 1.442695, %v1292_v34  ;;  %v1293_v37 = vsub.f32 %v1285_v29, %v1291_v35 }
 0x91c   :  { %2697 = vpow2.f32 %v1294_v36  ;;  %v1296_v38 = vmul.f32 1.442695, %v1293_v37 }
 0x91e   :  { %2699 = vpow2.f32 %v1296_v38 }
 0x926   :  { %v2698_v39 = vpop.eup %2697 }
 0x927   :  { %v1298_v40 = vsel %vm263_vm2, %v2698_v39, 0.0 }
 0x928   :  { %v2700_v41 = vpop.eup %2699  ;;  %1299 = vadd.xlane.f32.xlu0 %v1298_v40 }
 0x929   :  { %v1301_v42 = vsel %vm263_vm2, %v2700_v41, 0.0 }
 0x92a   :  { %1302 = vadd.xlane.f32.xlu1 %v1301_v42 }
 0x9b5   :  { %v1300_v43 = vpop.xlane.xlu0 %1299 }
 0x9b6   :  { %2701 = vrcp.f32 %v1300_v43 }
 0x9b7   :  { %v1303_v44 = vpop.xlane.xlu1 %1302 }
 0x9b8   :  { %2703 = vrcp.f32 %v1303_v44 }
 0x9c0   :  { %v2702_v45 = vpop.eup %2701 }
 0x9c1   :  { %v1306_v47 = vmul.f32 %v2702_v45, %v2698_v39 }
 0x9c2   :  { %v2704_v48 = vpop.eup %2703 }
 0x9c3   :  { %v1307_v49 = vmul.f32 %v2704_v48, %v2700_v41  ;;  %v1308_v50 = vpack.c.bf16 %v1306_v47, %v1306_v47 }
 0x9c5   :  { %2557 = vmatmul.mubr.msk.bf16.vlgmr.msra.gmra.mrb[40].mxu1 %vm263_vm2, %v1308_v50  ;;  %v1309_v52 = vpack.c.bf16 %v1307_v49, %v1307_v49 }
 0x9c6   :  { %2567 = vmatpush3.bf16.msra.mxu1 %v1409_v51  ;;  %2568 = vmatprep.mubr.msk.bf16.mxu1 %vm2748_vm0, %v2747_v1 }
 0x9c7   :  { %2563 = vmatmul.mubr.msk.bf16.vlgmr.msra.gmra.mrb[44].mxu0 %vm263_vm2, %v1309_v52  ;;  %2580 = vmatprep.subr.bf16.mxu1 %v2747_v1 }
 0x9c8   :  { %2576 = vmatprep.mubr.msk.bf16.mxu0 %vm2748_vm0, %v2747_v1  ;;  %2573 = vmatpush3.bf16.msra.mxu0 %v2671_v53 }
 0x9c9   :  { %2574 = vmatprep.subr.bf16.mxu0 %v2747_v1 }
 0x9cc   :  { %2575 = vmatpush3.bf16.msra.mxu0 %v2672_v54 }
 0x9cd   :  { %2588 = vmatprep.subr.bf16.mxu0 %v2747_v1 }
 0x9cf   :  { %2577 = vmatmul.mubr.msk.bf16.vlgmr.msra.gmra.mrb[48].mxu0 %vm84_vm1, %v2867_v7 }
 0x9d0   :  { %2592 = vmatprep.mubr.msk.bf16.mxu0 %vm2748_vm0, %v2747_v1  ;;  %2589 = vmatpush3.bf16.msra.mxu0 %v2673_v5 }
 0x9d1   :  { %2590 = vmatprep.subr.bf16.mxu0 %v2747_v1 }
 0x9d4   :  { %2591 = vmatpush3.bf16.msra.mxu0 %v2674_v6  ;;  %v2309_v6 = vld [vmem:[%s3264_s7 + $0xc] sm:$0xf] }
 0x9d5   :  { %2602 = vmatprep.subr.bf16.mxu0 %v2747_v1 }
 0x9d7   :  { %2593 = vmatmul.mubr.msk.bf16.vlgmr.msra.gmra.mrb[52].mxu0 %vm84_vm1, %v2867_v7 }
 0x9d8   :  { %2604 = vmatprep.mubr.msk.bf16.mxu0 %vm2748_vm0, %v2747_v1 }
 0xa98   :  { %v1350_v55 = vpop.f32.mrb[40].mxu1 }
 0xa99   :  { %v2558_v56 = vpop.f32.mrb[41].mxu1 }
 0xa9a   :  { %v1353_v57 = vpop.f32.mrb[42].mxu1  ;;  %v1396_v59 = vpop.f32.mrb[44].mxu0 }
 0xa9b   :  { %v1402_v62 = vpack.c.bf16 %v1396_v59, %v1350_v55  ;;  %v2559_v63 = vpop.f32.mrb[43].mxu1  ;;  %v2564_v0 = vpop.f32.mrb[45].mxu0 }
 0xa9c   :  { %v1399_v2 = vpop.f32.mrb[46].mxu0 }
 0xa9d   :  { %v2565_v3 = vpop.f32.mrb[47].mxu0  ;;  %2569 = vmatmul.mubr.msk.bf16.vlgmr.msra.gmra.mrb[44].mxu1 %vm263_vm2, %v1402_v62 }
 0xa9e   :  { %2581 = vmatpush3.bf16.msra.mxu1 %v2669_v60  ;;  %2584 = vmatprep.mubr.msk.bf16.mxu1 %vm2748_vm0, %v2747_v1 }
 0xa9f   :  { %2582 = vmatprep.subr.bf16.mxu1 %v2747_v1 }
 0xaa2   :  { %2583 = vmatpush3.bf16.msra.mxu1 %v2670_v4  ;;  %v1513_v8 = vpop.f32.mrb[48].mxu0 }
 0xaa3   :  { %2596 = vmatprep.subr.bf16.mxu1 %v2747_v1  ;;  %v2578_v9 = vpop.f32.mrb[49].mxu0  ;;  %v1514_v29 = vadd.f32 %v2283_v25, %v1513_v8 }
 0xaa4   :  { %v1516_v10 = vpop.f32.mrb[50].mxu0 }
 0xaa5   :  { %2585 = vmatmul.mubr.msk.bf16.vlgmr.msra.gmra.mrb[48].mxu1 %vm84_vm1, %v2867_v7  ;;  %v2579_v11 = vpop.f32.mrb[51].mxu0  ;;  %v2292_v7 = vld [vmem:[%s3261_s4 + $0x3] ss:$0 sm:$0xff]  ;;  %v1652_v31 = vpack.c.bf16 %v1514_v29, %v1514_v29  ;;  %v1517_v15 = vadd.f32 %v2283_v25, %v1516_v10 }
 0xaa6   :  { %2598 = vmatprep.mubr.msk.bf16.mxu1 %vm2748_vm0, %v2747_v1 }
 0xaa7   :  { %v1653_v19 = vpack.c.bf16 %v1517_v15, %v1517_v15 }
 0xaaa   :  { %v1645_v32 = vpop.f32.mrb[52].mxu0 }
 0xaab   :  { %v1646_v33 = vadd.f32 %v2301_v20, %v1645_v32  ;;  %v2594_v34 = vpop.f32.mrb[53].mxu0 }
 0xaac   :  { %v1648_v35 = vpop.f32.mrb[54].mxu0  ;;  %v2722_v34 = vld [vmem:[%s3280_s19 + $0x8] sm:$0xff] }
 0xaad   :  { %v1656_v36 = vpack.c.bf16 %v1646_v33, %v1646_v33  ;;  %v1649_v37 = vadd.f32 %v2301_v20, %v1648_v35  ;;  %v2595_v38 = vpop.f32.mrb[55].mxu0  ;;  %v2721_v20 = vld [vmem:[%s3280_s19] sm:$0xff] }
 0xaaf   :  { %v1780_v39 = vsel %vm385_vm3, %v1656_v36, 0  ;;  %v1657_v40 = vpack.c.bf16 %v1649_v37, %v1649_v37 }
 0xab1   :  { %v1826_v41 = vsel %vm385_vm3, %v1657_v40, 0 }
 0xb70   :  { %v1445_v12 = vpop.f32.mrb[44].mxu1 }
 0xb71   :  { %v3137_v13 = vadd.f32 %v1445_v12, %v3062_v58  ;;  %v2570_v14 = vpop.f32.mrb[45].mxu1  ;;  %v1875_v12 = vsel %vm385_vm3, %v2309_v6, 0  ;;  %v2680_v6 = vld [vmem:[%s3270_s13 + $0x18] sm:$0xff]  }
 0xb72   :  { %v1448_v16 = vpop.f32.mrb[46].mxu1 }
 0xb73   :  { %v3140_v17 = vadd.f32 %v1448_v16, %v3064_v61  ;;  %v2571_v18 = vpop.f32.mrb[47].mxu1 }
 0xb78   :  { %v1579_v21 = vpop.f32.mrb[48].mxu1 }
 0xb79   :  { %v1580_v22 = vadd.f32 %v2292_v7, %v1579_v21  ;;  %v2586_v23 = vpop.f32.mrb[49].mxu1 }
 0xb7a   :  { %v1582_v24 = vpop.f32.mrb[50].mxu1 }
 0xb7b   :  { %v1654_v58 = vpack.c.bf16 %v1580_v22, %v1580_v22  ;;  %v1583_v26 = vadd.f32 %v2292_v7, %v1582_v24  ;;  %v2587_v27 = vpop.f32.mrb[51].mxu1 }
 0xb7c   :  { %v2311_v27 = vld [vmem:[%s3265_s8] ss:$0 sm:$0xff] }
 0xb7d   :  { %v1662_v28 = vsel %vm263_vm2, %v1654_v58, 0  ;;  %v1655_v61 = vpack.c.bf16 %v1583_v26, %v1583_v26 }
 0xb7e   :  { %2597 = vmatpush3.bf16.xpose.msra.mxu1 %v1662_v28 }
 0xb7f   :  { %v1708_v30 = vsel %vm263_vm2, %v1655_v61, 0  ;;  %2608 = vmatprep.subr.bf16.mxu1 %v2747_v1 }
 0xb80   :  { %2603 = vmatpush3.bf16.xpose.msra.mxu0 %v1708_v30 }
 0xb81   :  { %2614 = vmatprep.subr.bf16.mxu0 %v2747_v1 }
 0xb85   :  { %2599 = vmatmul.mubr.msk.bf16.vlgmr.msra.gmra.mrb[52].mxu1 %vm263_vm2, %v1652_v31 }
 0xb86   :  { %2610 = vmatprep.mubr.msk.bf16.mxu1 %vm2748_vm0, %v2747_v1  ;;  %2609 = vmatpush3.bf16.msra.mxu1 %v1780_v39 }
 0xb87   :  { %2605 = vmatmul.mubr.msk.bf16.vlgmr.msra.gmra.mrb[56].mxu0 %vm263_vm2, %v1653_v19  ;;  %2620 = vmatprep.subr.bf16.mxu1 %v2747_v1 }
 0xb88   :  { %2616 = vmatprep.mubr.msk.bf16.mxu0 %vm2748_vm0, %v2747_v1  ;;  %2615 = vmatpush3.bf16.msra.mxu0 %v1826_v41 }
 0xb89   :  { %2626 = vmatprep.subr.bf16.mxu0 %v2747_v1 }
 0xc58   :  { %v1698_v42 = vpop.f32.mrb[52].mxu1 }
 0xc59   :  { %v1750_v43 = vmul.f32 0.35355338, %v1698_v42  ;;  %v2600_v44 = vpop.f32.mrb[53].mxu1 }
 0xc5a   :  { %v1701_v45 = vpop.f32.mrb[54].mxu1  ;;  %v1744_v46 = vpop.f32.mrb[56].mxu0 }
 0xc5b   :  { %v1751_v47 = vmul.f32 0.35355338, %v1744_v46  ;;  %v2601_v48 = vpop.f32.mrb[55].mxu1  ;;  %v2606_v49 = vpop.f32.mrb[57].mxu0  ;;  %v1752_v50 = vsel %vm263_vm2, %v1750_v43, -inf  ;;  %v2675_v45 = vld [vmem:[%s3268_s11] sm:$0xff]  }
 0xc5c   :  { %1753 = vmax.xlane.f32.xlu0 %v1752_v50  ;;  %v1747_v51 = vpop.f32.mrb[58].mxu0  ;;  %v2676_v46 = vld [vmem:[%s3268_s11 + $0x8] sm:$0xff]  }
 0xc5d   :  { %v2607_v52 = vpop.f32.mrb[59].mxu0  ;;  %v1755_v53 = vsel %vm263_vm2, %v1751_v47, -inf  ;;  %v2678_v48 = vld [vmem:[%s3270_s13 + $0x8] sm:$0xff]  }
 0xc5e   :  { %1756 = vmax.xlane.f32.xlu1 %v1755_v53 }
 0xce9   :  { %v1754_v54 = vpop.xlane.xlu0 %1753 }
 0xcea   :  { %v1758_v55 = vsub.f32 %v1750_v43, %v1754_v54 }
 0xceb   :  { %v1757_v56 = vpop.xlane.xlu1 %1756 }
 0xcec   :  { %v1760_v57 = vmul.f32 1.442695, %v1758_v55  ;;  %v1759_v59 = vsub.f32 %v1751_v47, %v1757_v56  ;;  %v2677_v47 = vld [vmem:[%s3270_s13] sm:$0xff]  }
 0xced   :  { %v2312_v56 = vld [vmem:[%s3266_s9] ss:$0 sm:$0xff] }
 0xcee   :  { %2705 = vpow2.f32 %v1760_v57  ;;  %v1762_v60 = vmul.f32 1.442695, %v1759_v59 }
 0xcf0   :  { %2707 = vpow2.f32 %v1762_v60 }
 0xcf8   :  { %v2706_v62 = vpop.eup %2705 }
 0xcf9   :  { %v1764_v63 = vsel %vm263_vm2, %v2706_v62, 0.0 }
 0xcfa   :  { %v2708_v0 = vpop.eup %2707  ;;  %1765 = vadd.xlane.f32.xlu0 %v1764_v63  ;;  %v2313_v63 = vld [vmem:[%s3267_s10] ss:$0 sm:$0xff] }
 0xcfb   :  { %v1767_v2 = vsel %vm263_vm2, %v2708_v0, 0.0 }
 0xcfc   :  { %1768 = vadd.xlane.f32.xlu1 %v1767_v2 }
 0xd87   :  { %v1766_v3 = vpop.xlane.xlu0 %1765 }
 0xd88   :  { %2709 = vrcp.f32 %v1766_v3 }
 0xd89   :  { %v1769_v4 = vpop.xlane.xlu1 %1768 }
 0xd8a   :  { %2711 = vrcp.f32 %v1769_v4 }
 0xd92   :  { %v2710_v5 = vpop.eup %2709 }
 0xd93   :  { %v1772_v8 = vmul.f32 %v2710_v5, %v2706_v62  ;;  %v2679_v5 = vld [vmem:[%s3270_s13 + $0x10] sm:$0xff]  }
 0xd94   :  { %v2712_v9 = vpop.eup %2711 }
 0xd95   :  { %v1773_v10 = vmul.f32 %v2712_v9, %v2708_v0  ;;  %v1774_v11 = vpack.c.bf16 %v1772_v8, %v1772_v8  ;;  %v2314_v8 = vld [vmem:[%s3269_s12] ss:$0 sm:$0xff] }
 0xd97   :  { %2611 = vmatmul.mubr.msk.bf16.vlgmr.msra.gmra.mrb[56].mxu1 %vm263_vm2, %v1774_v11  ;;  %v1775_v14 = vpack.c.bf16 %v1773_v10, %v1773_v10 }
 0xd98   :  { %2621 = vmatpush3.bf16.msra.mxu1 %v1875_v12  ;;  %2622 = vmatprep.mubr.msk.bf16.mxu1 %vm2748_vm0, %v2747_v1 }
 0xd99   :  { %2617 = vmatmul.mubr.msk.bf16.vlgmr.msra.gmra.mrb[60].mxu0 %vm263_vm2, %v1775_v14  ;;  %2634 = vmatprep.subr.bf16.mxu1 %v2747_v1 }
 0xd9a   :  { %2630 = vmatprep.mubr.msk.bf16.mxu0 %vm2748_vm0, %v2747_v1  ;;  %2627 = vmatpush3.bf16.msra.mxu0 %v2675_v45  ;;  %v2325_v45 = vld [vmem:[%s3273_s16] ss:$0 sm:$0xff] }
 0xd9b   :  { %2628 = vmatprep.subr.bf16.mxu0 %v2747_v1 }
 0xd9e   :  { %2629 = vmatpush3.bf16.msra.mxu0 %v2676_v46 }
 0xe6a   :  { %v1816_v16 = vpop.f32.mrb[56].mxu1 }
 0xe6b   :  { %v2612_v18 = vpop.f32.mrb[57].mxu1 }
 0xe6c   :  { %v1819_v7 = vpop.f32.mrb[58].mxu1  ;;  %v1862_v21 = vpop.f32.mrb[60].mxu0 }
 0xe6d   :  { %v1868_v22 = vpack.c.bf16 %v1862_v21, %v1816_v16  ;;  %v2613_v23 = vpop.f32.mrb[59].mxu1  ;;  %v2618_v24 = vpop.f32.mrb[61].mxu0 }
 0xe6e   :  { %v1865_v25 = vpop.f32.mrb[62].mxu0 }
 0xe6f   :  { %v2619_v58 = vpop.f32.mrb[63].mxu0  ;;  %2623 = vmatmul.mubr.msk.bf16.vlgmr.msra.gmra.mrb[60].mxu1 %vm263_vm2, %v1868_v22 }
 0xe70   :  { %2642 = vmatprep.mubr.msk.bf16.mxu1 %vm2748_vm0, %v2747_v1  ;;  %2635 = vmatpush3.bf16.msra.mxu1 %v2677_v47 }
 0xe71   :  { %2636 = vmatprep.subr.bf16.mxu1 %v2747_v1 }
 0xe74   :  { %2637 = vmatpush3.bf16.msra.mxu1 %v2678_v48 }
 0xe75   :  { %2638 = vmatprep.subr.bf16.mxu1 %v2747_v1 }
 0xe78   :  { %2639 = vmatpush3.bf16.msra.mxu1 %v2679_v5 }
 0xe79   :  { %2640 = vmatprep.subr.bf16.mxu1 %v2747_v1  ;;  %v2318_v1 = vld [vmem:[%s3271_s14] ss:$0 sm:$0xff] }
 0xe7c   :  { %2641 = vmatpush3.bf16.msra.mxu1 %v2680_v6 }
 0xf42   :  { %v1911_v26 = vpop.f32.mrb[60].mxu1 }
 0xf43   :  { %v1918_v28 = vadd.f32 %v1911_v26, %v3137_v13  ;;  %v2624_v61 = vpop.f32.mrb[61].mxu1 }
 0xf44   :  { %v1914_v29 = vpop.f32.mrb[62].mxu1 }
 0xf45   :  { %v1927_v30 = vadd.f32 %v2311_v27, %v1918_v28  ;;  %v1919_v31 = vadd.f32 %v1914_v29, %v3140_v17  ;;  %v2625_v15 = vpop.f32.mrb[63].mxu1 }
 0xf47   :  { %v1928_v19 = vadd.f32 %v2311_v27, %v1919_v31  ;;  %v1929_v32 = vadd.f32 %v2721_v20, %v1927_v30 }
 0xf49   :  { %v1931_v33 = vsel %vm84_vm1, %v1929_v32, 0.0  ;;  %v1930_v35 = vadd.f32 %v2722_v34, %v1928_v19 }
 0xf4a   :  { %1932 = vadd.xlane.f32.xlu0 %v1931_v33 }
 0xf4b   :  { %v1934_v13 = vsel %vm84_vm1, %v1930_v35, 0.0 }
 0xf4c   :  { %1935 = vadd.xlane.f32.xlu1 %v1934_v13 }
 0xfd7   :  { %v1933_v36 = vpop.xlane.xlu0 %1932 }
 0xfd8   :  { %v1938_v17 = vmul.f32 0.03125, %v1933_v36 }
 0xfd9   :  { %v1936_v37 = vpop.xlane.xlu1 %1935 }
 0xfda   :  { %v1940_v38 = vsub.f32 %v1929_v32, %v1938_v17  ;;  %v1939_v39 = vmul.f32 0.03125, %v1936_v37 }
 0xfdc   :  { %v1941_v40 = vsub.f32 %v1930_v35, %v1939_v39  ;;  %v1942_v41 = vmul.f32 %v1940_v38, %v1940_v38 }
 0xfde   :  { %v1944_v42 = vsel %vm84_vm1, %v1942_v41, 0.0  ;;  %v1943_v43 = vmul.f32 %v1941_v40, %v1941_v40 }
 0xfdf   :  { %1945 = vadd.xlane.f32.xlu0 %v1944_v42  ;;  %v2324_v42 = vld [vmem:[%s3272_s15] ss:$0 sm:$0xff] }
 0xfe0   :  { %v1947_v44 = vsel %vm84_vm1, %v1943_v43, 0.0 }
 0xfe1   :  { %1948 = vadd.xlane.f32.xlu1 %v1947_v44 }
0x106c   :  { %v1946_v49 = vpop.xlane.xlu0 %1945 }
0x106d   :  { %v1950_v50 = vmul.f32 0.03125, %v1946_v49 }
0x106e   :  { %v1949_v51 = vpop.xlane.xlu1 %1948 }
0x106f   :  { %v1952_v52 = vadd.f32 1e-05, %v1950_v50  ;;  %v1951_v53 = vmul.f32 0.03125, %v1949_v51 }
0x1071   :  { %2713 = vrsqrt.f32 %v1952_v52  ;;  %v1953_v54 = vadd.f32 1e-05, %v1951_v53 }
0x1073   :  { %2715 = vrsqrt.f32 %v1953_v54 }
0x107b   :  { %v2714_v55 = vpop.eup %2713 }
0x107c   :  { %v1956_v57 = vmul.f32 %v2714_v55, %v1940_v38 }
0x107d   :  { %v2716_v59 = vpop.eup %2715 }
0x107e   :  { %v1965_v60 = vmul.f32 %v2312_v56, %v1956_v57  ;;  %v1957_v62 = vmul.f32 %v2716_v59, %v1941_v40 }
0x1080   :  { %v1966_v0 = vmul.f32 %v2312_v56, %v1957_v62  ;;  %v1974_v2 = vadd.f32 %v2313_v63, %v1965_v60 }
0x1082   :  { %v1975_v3 = vadd.f32 %v2313_v63, %v1966_v0 }
0x1084   :  { %v1976_v4 = vpack.c.bf16 %v1975_v3, %v1974_v2 }
0x1086   :  { %2631 = vmatmul.mubr.msk.bf16.vlgmr.msra.gmra.mrb[64].mxu0 %vm84_vm1, %v1976_v4 }
0x1159   :  { %v2037_v9 = vpop.f32.mrb[64].mxu0 }
0x115a   :  { %v2038_v10 = vadd.f32 %v2314_v8, %v2037_v9  ;;  %v2632_v11 = vpop.f32.mrb[65].mxu0 }
0x115b   :  { %v2040_v12 = vpop.f32.mrb[66].mxu0 }
0x115c   :  { %v2041_v14 = vadd.f32 %v2314_v8, %v2040_v12  ;;  %v2633_v16 = vpop.f32.mrb[67].mxu0  ;;  %v2044_v18 = vmax.f32 %v2038_v10, 0.0 }
0x115e   :  { %v2045_v7 = vmax.f32 %v2041_v14, 0.0 }
0x1160   :  { %v2046_v21 = vpack.c.bf16 %v2045_v7, %v2044_v18 }
0x1162   :  { %2643 = vmatmul.mubr.msk.bf16.vlgmr.msra.gmra.mrb[64].mxu1 %vm2086_vm4, %v2046_v21 }
0x1235   :  { %v2124_v22 = vpop.f32.mrb[64].mxu1 }
0x1236   :  { %v2125_v23 = vadd.f32 %v2318_v1, %v2124_v22  ;;  %v2644_v24 = vpop.f32.mrb[65].mxu1 }
0x1237   :  { %v2127_v25 = vpop.f32.mrb[66].mxu1 }
0x1238   :  { %v2128_v58 = vadd.f32 %v2318_v1, %v2127_v25  ;;  %v2645_v26 = vpop.f32.mrb[67].mxu1  ;;  %v2131_v27 = vadd.f32 %v2125_v23, %v1974_v2 }
0x123a   :  { %v2133_v28 = vsel %vm84_vm1, %v2131_v27, 0.0  ;;  %v2132_v61 = vadd.f32 %v2128_v58, %v1975_v3 }
0x123b   :  { %2134 = vadd.xlane.f32.xlu0 %v2133_v28 }
0x123c   :  { %v2136_v29 = vsel %vm84_vm1, %v2132_v61, 0.0 }
0x123d   :  { %2137 = vadd.xlane.f32.xlu1 %v2136_v29 }
0x12c8   :  { %v2135_v30 = vpop.xlane.xlu0 %2134 }
0x12c9   :  { %v2139_v31 = vmul.f32 0.03125, %v2135_v30 }
0x12ca   :  { %v2138_v15 = vpop.xlane.xlu1 %2137 }
0x12cb   :  { %v2141_v19 = vsub.f32 %v2131_v27, %v2139_v31  ;;  %v2140_v20 = vmul.f32 0.03125, %v2138_v15 }
0x12cd   :  { %v2142_v32 = vsub.f32 %v2132_v61, %v2140_v20  ;;  %v2143_v33 = vmul.f32 %v2141_v19, %v2141_v19 }
0x12cf   :  { %v2145_v34 = vsel %vm84_vm1, %v2143_v33, 0.0  ;;  %v2144_v35 = vmul.f32 %v2142_v32, %v2142_v32 }
0x12d0   :  { %2146 = vadd.xlane.f32.xlu0 %v2145_v34 }
0x12d1   :  { %v2148_v13 = vsel %vm84_vm1, %v2144_v35, 0.0 }
0x12d2   :  { %2149 = vadd.xlane.f32.xlu1 %v2148_v13 }
0x135d   :  { %v2147_v36 = vpop.xlane.xlu0 %2146 }
0x135e   :  { %v2151_v17 = vmul.f32 0.03125, %v2147_v36 }
0x135f   :  { %v2150_v37 = vpop.xlane.xlu1 %2149 }
0x1360   :  { %v2153_v38 = vadd.f32 1e-05, %v2151_v17  ;;  %v2152_v39 = vmul.f32 0.03125, %v2150_v37 }
0x1362   :  { %2717 = vrsqrt.f32 %v2153_v38  ;;  %v2154_v40 = vadd.f32 1e-05, %v2152_v39 }
0x1364   :  { %2719 = vrsqrt.f32 %v2154_v40 }
0x136c   :  { %v2718_v41 = vpop.eup %2717 }
0x136d   :  { %v2157_v43 = vmul.f32 %v2718_v41, %v2141_v19 }
0x136e   :  { %v2720_v44 = vpop.eup %2719 }
0x136f   :  { %v2158_v46 = vmul.f32 %v2720_v44, %v2142_v32  ;;  %v2166_v47 = vmul.f32 %v2324_v42, %v2157_v43 }
0x1371   :  { %v2167_v48 = vmul.f32 %v2324_v42, %v2158_v46  ;;  %v2175_v49 = vadd.f32 %v2325_v45, %v2166_v47 }
0x1373   :  { %v2176_v50 = vadd.f32 %v2325_v45, %v2167_v48  ;;  %2177 = vst.msk [vmem:[#allocation2] sm:$0xff] %vm84_vm1, %v2175_v49 }
0x1375   :  { %2178 = vst.msk [vmem:[#allocation2 + $0x8] sm:$0xff] %vm84_vm1, %v2176_v50 }
0x1376   :  { %2734 = shalt.err (!%p2731_p4)
}
0x1377   :  { %s2735_s28 = scalar_lea.hbm %s3274_s17, 256 }
0x1378   :  { %p2736_p5 = scmp.ne.s32.totalorder %s3274_s17, %s2735_s28  ;;  %p2739_p6 = scmp.lt.u32.totalorder %s2735_s28, %s3274_s17 }
0x137a   :  { %p2741_p7 = pnand %p2739_p6, %p2736_p5 }
0x137c   :  { %2744 = shalt.err (!%p2741_p7)
}
0x137d   :  { %s2750_s30 = smov 128   ;;  %s2751_s18 = smov 8  }
0x137e   :  { %2190 = dma.vmem_to_hbm [thread:$0]  %s2185_s26, 256, %s3274_s17, [#allocation3], %s2750_s30, %s2750_s30, %s2751_s18  }
0x137f   :  { %2745 = dma.done.wait [#allocation3], 256  }
0x1380   :  { %2746 = vsyncadd [#allocation3], 4294967040 }
0x1381   :  { %2194 = vsyncpa [#allocation3], 1 }

</bundles_post_ra>
